<compile_context>
chip_gen: v7x
topology: tpu7x:2x2x1
jax: 0.10.0
libtpu: 0.0.40
codegen_flags: <defaults>
</compile_context>

<pallas_src>
import functools

import jax
import jax.numpy as jnp
import numpy as np
from jax import lax
from jax.experimental import pallas as pl
from jax.experimental.pallas import tpu as pltpu


def _round_up(x, m):
    return ((x + m - 1) // m) * m


def _vmem_budget_bytes():
    """Generation-aware VMEM budget (review: stay ~48 MiB on v7x's 64 MiB,
    raise the 16/32 MiB scoped default on v5e/v6e's 128 MiB)."""
    cap = 64 * 1024 * 1024
    try:
        info = pltpu.get_tpu_info()
        cap = int(getattr(info, "vmem_capacity_bytes", cap) or cap)
    except Exception:
        pass
    return max(32 * 1024 * 1024, min(int(cap * 0.75), 100 * 1024 * 1024))


def _pick_b_chunk(B):
    # Batch is the only parallel axis of the recurrence: split it across the
    # two TensorCores (v7x megacore) when it tiles cleanly in multiples of 8.
    if B % 16 == 0:
        return B // 2
    return B


def _pick_t_chunk(T, B, H, budget_bytes):
    # Size the T-chunk so the double-buffered bf16 gates_pre (tc,B,4H) and
    # h_all (tc,B,H) streams plus W_hh + carries fit the per-generation budget.
    per_t = 2 * (B * 4 * H * 2) + 2 * (B * H * 2)            # 2-deep in + out, bf16
    fixed = (H * 4 * H * 2) + 8 * (B * H * 4) + (2 << 20)    # W_hh + carries + slack
    avail = max(budget_bytes - fixed, per_t)
    tc_max = max(1, avail // per_t)
    tc = 1
    for d in range(1, T + 1):                                # largest divisor of T <= tc_max
        if T % d == 0 and d <= tc_max:
            tc = d
    return tc


def _pick_row_tile(rows):
    # ~256 rows/tile (review: 256-512) keeps the f32 output block + bf16 W tile
    # double-buffered well under VMEM on all generations.
    rt = min(rows, 256)
    if rt < rows:
        rt = max(8, (rt // 8) * 8)
    return rt


def _decoder_vocab_tiling(V):
    # Lane-dense vocab tiles.  base=512 is safe on v5e defaults; bump to
    # 1024-2048 on v6e (128 MiB VMEM) if the decoder is weight-stream bound.
    base = 512
    cand = min(base, _round_up(V, 128))
    if cand >= V:
        return V, 1                     # single exact-V tile, no padding needed
    vp = _round_up(V, cand)
    return cand, vp // cand


# ----------------------------------------------------------------------------
# Kernel A: T-chunked LSTM recurrence.  Grid = (batch chunks, T chunks).
# Carry h/c lives in VMEM scratch and persists across T chunks.
# ----------------------------------------------------------------------------
def _lstm_recurrence_kernel(gpre_ref,   # (tc, bc, 4H) bf16  x@W_ih^T + bias
                            h0_ref,     # (1, bc, H)   f32
                            c0_ref,     # (1, bc, H)   f32
                            whh_ref,    # (H, 4H)      bf16  W_hh^T
                            hall_ref,   # (tc, bc, H)  bf16  all hidden states
                            hn_ref,     # (1, bc, H)   f32   final hidden (aliased h0)
                            cn_ref,     # (1, bc, H)   f32   final cell   (aliased c0)
                            h_sc,       # (bc, H)      f32   carry scratch
                            c_sc):      # (bc, H)      f32   carry scratch
    t_blk = pl.program_id(1)
    tc = gpre_ref.shape[0]
    H = h0_ref.shape[-1]

    # First T-chunk of this batch slice: load the initial carry.
    @pl.when(t_blk == 0)
    def _():
        h_sc[...] = h0_ref[0]
        c_sc[...] = c0_ref[0]

    def step(t, carry):
        h, c = carry
        # Single MXU op on the serial critical path; bf16 operands, f32 acc.
        # W_hh^T is consumed from VMEM inside the loop (not held in vregs).
        gates = gpre_ref[t].astype(jnp.float32) + jnp.dot(
            h.astype(whh_ref.dtype), whh_ref[...],
            preferred_element_type=jnp.float32)
        # PyTorch gate order: i, f, g, o.
        i = jax.nn.sigmoid(gates[:, 0 * H:1 * H])
        f = jax.nn.sigmoid(gates[:, 1 * H:2 * H])
        g = jnp.tanh(gates[:, 2 * H:3 * H])
        o = jax.nn.sigmoid(gates[:, 3 * H:4 * H])
        c_new = f * c + i * g
        h_new = o * jnp.tanh(c_new)
        hall_ref[t] = h_new.astype(hall_ref.dtype)
        return (h_new, c_new)

    unroll = max(1, min(tc, 8))   # cap unroll (full unroll at big tc*H spills)
    h_fin, c_fin = lax.fori_loop(0, tc, step, (h_sc[...], c_sc[...]),
                                 unroll=unroll)

    # Persist the carry for the next T-chunk of this batch slice.
    h_sc[...] = h_fin
    c_sc[...] = c_fin

    # hn/cn only need to hit HBM once, after the last chunk.
    @pl.when(t_blk == pl.num_programs(1) - 1)
    def _():
        hn_ref[0] = h_fin
        cn_ref[0] = c_fin


def _lstm_recurrence_pallas(gates_pre, h0, c0, w_hh_t, *, t_chunk=None):
    T, B, G = gates_pre.shape
    H = w_hh_t.shape[0]
    budget = _vmem_budget_bytes()
    tc = t_chunk if t_chunk is not None else _pick_t_chunk(T, B, H, budget)
    assert T % tc == 0, "t_chunk must divide T"
    bc = _pick_b_chunk(B)
    assert B % bc == 0
    n_b, n_t = B // bc, T // tc

    return pl.pallas_call(
        _lstm_recurrence_kernel,
        out_shape=(
            jax.ShapeDtypeStruct((T, B, H), jnp.bfloat16),   # all hidden states
            jax.ShapeDtypeStruct((1, B, H), jnp.float32),    # h_n
            jax.ShapeDtypeStruct((1, B, H), jnp.float32),    # c_n
        ),
        grid_spec=pltpu.PrefetchScalarGridSpec(
            num_scalar_prefetch=0,
            grid=(n_b, n_t),
            in_specs=[
                pl.BlockSpec((tc, bc, G), lambda b, t: (t, b, 0)),   # gates_pre
                pl.BlockSpec((1, bc, H), lambda b, t: (0, b, 0)),    # h0
                pl.BlockSpec((1, bc, H), lambda b, t: (0, b, 0)),    # c0
                pl.BlockSpec((H, G), lambda b, t: (0, 0)),           # W_hh^T
            ],
            out_specs=[
                pl.BlockSpec((tc, bc, H), lambda b, t: (t, b, 0)),   # h_all
                pl.BlockSpec((1, bc, H), lambda b, t: (0, b, 0)),    # h_n
                pl.BlockSpec((1, bc, H), lambda b, t: (0, b, 0)),    # c_n
            ],
            scratch_shapes=[
                pltpu.VMEM((bc, H), jnp.float32),                    # h carry
                pltpu.VMEM((bc, H), jnp.float32),                    # c carry
            ],
        ),
        # h0 -> h_n, c0 -> c_n: no extra resident HBM buffers.
        input_output_aliases={1: 1, 2: 2},
        compiler_params=pltpu.CompilerParams(
            dimension_semantics=("parallel", "arbitrary"),
            vmem_limit_bytes=budget),
    )(gates_pre, h0, c0, w_hh_t)


# ----------------------------------------------------------------------------
# Kernel B: decoder projection.  2-D (row-tile x vocab-tile) grid, writes
# batch-major exact-V logits directly (no logits transpose, no depad pass).
# ----------------------------------------------------------------------------
def _decoder_kernel(h_ref, w_ref, b_ref, o_ref):
    o_ref[...] = (
        jnp.dot(h_ref[...], w_ref[...], preferred_element_type=jnp.float32)
        + b_ref[...]
    ).astype(o_ref.dtype)


def _decoder_pallas(h2d, w_dec_t, b_dec, V, *, row_tile=None):
    rows, H = h2d.shape
    v_tile, n_v = _decoder_vocab_tiling(V)
    rt = row_tile if row_tile is not None else _pick_row_tile(rows)
    n_r = pl.cdiv(rows, rt)
    # TODO(synk): deepen gates/weight prefetch with pipeline_mode=pl.Buffered(3)
    # on v5e if the W_dec stream is still exposed at realistic vocab sizes.
    return pl.pallas_call(
        _decoder_kernel,
        out_shape=jax.ShapeDtypeStruct((rows, V), jnp.float32),
        grid_spec=pltpu.PrefetchScalarGridSpec(
            num_scalar_prefetch=0,
            grid=(n_r, n_v),
            in_specs=[
                pl.BlockSpec((rt, H), lambda r, v: (r, 0)),        # hidden rows (bf16)
                pl.BlockSpec((H, v_tile), lambda r, v: (0, v)),    # W_dec^T tile (bf16)
                pl.BlockSpec((1, v_tile), lambda r, v: (0, v)),    # bias tile (f32)
            ],
            out_specs=pl.BlockSpec((rt, v_tile), lambda r, v: (r, v)),
        ),
        compiler_params=pltpu.CompilerParams(
            dimension_semantics=("parallel", "parallel"),
            vmem_limit_bytes=_vmem_budget_bytes()),
    )(h2d, w_dec_t, b_dec)


# ----------------------------------------------------------------------------
# Model wrapper (mirrors LSTMModel.forward)
# ----------------------------------------------------------------------------
def init_params(key, vocab_size, embedding_dim, hidden_dim):
    ks = jax.random.split(key, 6)
    H = hidden_dim
    k_lstm = 1.0 / np.sqrt(H)

    embedding = jax.random.normal(ks[0], (vocab_size, embedding_dim), jnp.float32)

    w_ih = jax.random.uniform(ks[1], (4 * H, embedding_dim), jnp.float32, -k_lstm, k_lstm)
    w_hh = jax.random.uniform(ks[2], (4 * H, H), jnp.float32, -k_lstm, k_lstm)
    b_ih = jax.random.uniform(ks[3], (4 * H,), jnp.float32, -k_lstm, k_lstm)
    b_hh = jax.random.uniform(ks[4], (4 * H,), jnp.float32, -k_lstm, k_lstm)
    # init_lstm: forget-gate slice [H:2H] of BOTH biases filled with 2.0
    # (fused forget bias = 4.0); input_bias=False default.
    b_ih = b_ih.at[H:2 * H].set(2.0)
    b_hh = b_hh.at[H:2 * H].set(2.0)

    w_dec = jax.random.uniform(ks[5], (vocab_size, H), jnp.float32, -k_lstm, k_lstm)
    b_dec = jnp.zeros((vocab_size,), jnp.float32)

    # Decoder weight: transpose + pad vocab up to a multiple of the vocab tile
    # so weight/bias tiles are lane-dense; the logits output stays exact-V
    # (masked final tile in the kernel, no depad pass).  Streamed weight bf16.
    v_tile, n_v = _decoder_vocab_tiling(vocab_size)
    vp = v_tile * n_v
    w_dec_t = jnp.zeros((H, vp), jnp.bfloat16).at[:, :vocab_size].set(
        jnp.transpose(w_dec).astype(jnp.bfloat16))
    b_dec_p = jnp.zeros((1, vp), jnp.float32).at[:, :vocab_size].set(b_dec[None, :])

    return {
        "embedding": embedding,                               # (V, E)   f32
        "w_ih_t": jnp.transpose(w_ih),                        # (E, 4H)  f32 (XLA glue matmul)
        "w_hh_t": jnp.transpose(w_hh).astype(jnp.bfloat16),   # (H, 4H)  bf16 (recurrence weight)
        "bias": (b_ih + b_hh)[None, :],                       # (1, 4H)  f32
        "w_dec_t": w_dec_t,                                   # (H, Vp)  bf16
        "b_dec": b_dec_p,                                     # (1, Vp)  f32
    }


def lstm_model_forward(params, tokens, hidden, *, t_chunk=None, row_tile=None):
    """tokens: (B, T) int32; hidden = (h0, c0) each (1, B, H) f32."""
    h0, c0 = hidden
    B, T = tokens.shape
    E = params["embedding"].shape[1]
    V = params["embedding"].shape[0]
    H = params["w_hh_t"].shape[0]

    # Embedding gather is glue (plain JAX).  Embed tokens.T so the activation
    # comes out time-major directly -> no (B,T,4H) HBM transpose.
    emb = jnp.take(params["embedding"], tokens.T, axis=0)               # (T, B, E)

    # Hoisted input projection: ONE (T*B,E)x(E,4H) matmul for ALL steps, off
    # the serial critical path; stored bf16 to halve the recurrence HBM stream.
    gp = emb.reshape(T * B, E) @ params["w_ih_t"] + params["bias"]      # f32
    gates_pre = gp.reshape(T, B, 4 * H).astype(jnp.bfloat16)

    h_all, hn, cn = _lstm_recurrence_pallas(gates_pre, h0, c0, params["w_hh_t"],
                                            t_chunk=t_chunk)

    # Transpose only the SMALL (T,B,H) bf16 hidden slab to batch-major; the
    # decoder writes (B*T, V) logits row-major so reshaping to (B,T,V) is free.
    h2d = jnp.transpose(h_all, (1, 0, 2)).reshape(B * T, H)             # bf16
    dec2d = _decoder_pallas(h2d, params["w_dec_t"], params["b_dec"], V,
                            row_tile=row_tile)
    decoded = dec2d.reshape(B, T, V)
    return decoded, (hn, cn)


# ----------------------------------------------------------------------------
# Pure-JAX reference (same math / same storage precisions, for correctness)
# ----------------------------------------------------------------------------
def reference_forward(params, tokens, hidden):
    h0, c0 = hidden
    B, T = tokens.shape
    E = params["embedding"].shape[1]
    V = params["embedding"].shape[0]
    H = params["w_hh_t"].shape[0]

    emb = jnp.take(params["embedding"], tokens.T, axis=0)               # (T, B, E)
    gp = emb.reshape(T * B, E) @ params["w_ih_t"] + params["bias"]
    gp = gp.reshape(T, B, 4 * H).astype(jnp.bfloat16)
    whh = params["w_hh_t"]                                               # bf16

    def step(carry, g_t):
        h, c = carry
        gates = g_t.astype(jnp.float32) + jnp.dot(
            h.astype(jnp.bfloat16), whh, preferred_element_type=jnp.float32)
        i = jax.nn.sigmoid(gates[:, :H])
        f = jax.nn.sigmoid(gates[:, H:2 * H])
        g = jnp.tanh(gates[:, 2 * H:3 * H])
        o = jax.nn.sigmoid(gates[:, 3 * H:])
        c = f * c + i * g
        h = o * jnp.tanh(c)
        return (h, c), h.astype(jnp.bfloat16)

    (hn, cn), hs = lax.scan(step, (h0[0], c0[0]), gp)                    # hs: (T,B,H) bf16
    h2d = jnp.transpose(hs, (1, 0, 2)).reshape(B * T, H)
    dec = jnp.dot(h2d, params["w_dec_t"][:, :V],
                  preferred_element_type=jnp.float32) + params["b_dec"][:, :V]
    return dec.reshape(B, T, V), (hn[None], cn[None])


if __name__ == "__main__":
    vocab_size, embedding_dim, hidden_dim = 50, 16, 32
    batch, seq = 2, 8

    key = jax.random.PRNGKey(0)
    k_params, k_tok = jax.random.split(key)
    params = init_params(k_params, vocab_size, embedding_dim, hidden_dim)

    tokens = jax.random.randint(k_tok, (batch, seq), 0, vocab_size, jnp.int32)
    h0 = jnp.zeros((1, batch, hidden_dim), jnp.float32)   # init_hidden
    c0 = jnp.zeros((1, batch, hidden_dim), jnp.float32)

    ref_dec, (ref_hn, ref_cn) = reference_forward(params, tokens, (h0, c0))

    # Auto-tuned tiling path.
    fwd = jax.jit(lstm_model_forward)
    decoded, (hn, cn) = fwd(params, tokens, (h0, c0))
    jax.block_until_ready((decoded, hn, cn))

    # Forced multi-chunk path: exercises the cross-chunk h/c carry and row tiling.
    fwd_chunked = jax.jit(functools.partial(lstm_model_forward, t_chunk=4, row_tile=8))
    decoded2, (hn2, cn2) = fwd_chunked(params, tokens, (h0, c0))
    jax.block_until_ready((decoded2, hn2, cn2))

    for d, hh, cc in ((decoded, hn, cn), (decoded2, hn2, cn2)):
        np.testing.assert_allclose(np.asarray(d), np.asarray(ref_dec), rtol=2e-2, atol=2e-2)
        np.testing.assert_allclose(np.asarray(hh), np.asarray(ref_hn), rtol=2e-2, atol=2e-2)
        np.testing.assert_allclose(np.asarray(cc), np.asarray(ref_cn), rtol=2e-2, atol=2e-2)
        assert d.shape == (batch, seq, vocab_size)
        assert hh.shape == (1, batch, hidden_dim) and cc.shape == (1, batch, hidden_dim)

    print("KERNEL_OK")
</pallas_src>

<mosaic_0001>
module attributes {stable_mosaic.version = 11 : i64} {
  func.func @_decoder_kernel(%arg0: i32, %arg1: i32, %arg2: memref<16x32xbf16, #tpu.memory_space<vmem>>, %arg3: memref<32x50xbf16, #tpu.memory_space<vmem>>, %arg4: memref<1x50xf32, #tpu.memory_space<vmem>>, %arg5: memref<16x50xf32, #tpu.memory_space<vmem>>) attributes {dimension_semantics = [#tpu.dimension_semantics<parallel>, #tpu.dimension_semantics<parallel>], iteration_bounds = array<i64: 1, 1>, scalar_prefetch = 0 : i64, scratch_operands = 0 : i64, tpu.core_type = #tpu.core_type<tc>, window_params = [{transform_indices = @transform_0, window_bounds = array<i64: 16, 32>}, {transform_indices = @transform_1, window_bounds = array<i64: 32, 50>}, {transform_indices = @transform_2, window_bounds = array<i64: 1, 50>}, {transform_indices = @transform_3, window_bounds = array<i64: 16, 50>}]} {
    %c0 = arith.constant 0 : index
    %c0_0 = arith.constant 0 : index
    %0 = vector.load %arg2[%c0, %c0_0] : memref<16x32xbf16, #tpu.memory_space<vmem>>, vector<16x32xbf16>
    %c0_1 = arith.constant 0 : index
    %c0_2 = arith.constant 0 : index
    %1 = vector.load %arg3[%c0_1, %c0_2] : memref<32x50xbf16, #tpu.memory_space<vmem>>, vector<32x50xbf16>
    %cst = arith.constant dense<0.000000e+00> : vector<16x50xf32>
    %2 = tpu.matmul %0, %1, %cst {dimension_numbers = #tpu.dot_dimension_numbers<[1], [0], [0], [1], [0, 0, 1, 1], [], []>} : vector<16x32xbf16>, vector<32x50xbf16>, vector<16x50xf32> -> vector<16x50xf32>
    %c0_3 = arith.constant 0 : index
    %c0_4 = arith.constant 0 : index
    %3 = vector.load %arg4[%c0_3, %c0_4] : memref<1x50xf32, #tpu.memory_space<vmem>>, vector<1x50xf32>
    %4 = vector.broadcast %3 : vector<1x50xf32> to vector<16x50xf32>
    %5 = arith.addf %2, %4 : vector<16x50xf32>
    %c0_5 = arith.constant 0 : index
    %c0_6 = arith.constant 0 : index
    %6 = vector.load %arg5[%c0_5, %c0_6] : memref<16x50xf32, #tpu.memory_space<vmem>>, vector<16x50xf32>
    tpu.vector_store %arg5[%c0_5, %c0_6], %5 {strides = array<i32>} : memref<16x50xf32, #tpu.memory_space<vmem>>, vector<16x50xf32>,
    return
  }
  func.func @transform_0(%arg0: i32, %arg1: i32) -> (i32, i32) {
    %c0_i32 = arith.constant 0 : i32
    %c0_i32_0 = arith.constant 0 : i32
    return %arg0, %c0_i32 : i32, i32
  }
  func.func @transform_1(%arg0: i32, %arg1: i32) -> (i32, i32) {
    %c0_i32 = arith.constant 0 : i32
    %c0_i32_0 = arith.constant 0 : i32
    return %c0_i32, %arg1 : i32, i32
  }
  func.func @transform_2(%arg0: i32, %arg1: i32) -> (i32, i32) {
    %c0_i32 = arith.constant 0 : i32
    %c0_i32_0 = arith.constant 0 : i32
    return %c0_i32, %arg1 : i32, i32
  }
  func.func @transform_3(%arg0: i32, %arg1: i32) -> (i32, i32) {
    %c0_i32 = arith.constant 0 : i32
    return %arg0, %arg1 : i32, i32
  }
}

module attributes {stable_mosaic.version = 11 : i64} {
  func.func @_lstm_recurrence_kernel(%arg0: i32, %arg1: i32, %arg2: memref<8x2x128xbf16, #tpu.memory_space<vmem>>, %arg3: memref<1x2x32xf32, #tpu.memory_space<vmem>>, %arg4: memref<1x2x32xf32, #tpu.memory_space<vmem>>, %arg5: memref<32x128xbf16, #tpu.memory_space<vmem>>, %arg6: memref<8x2x32xbf16, #tpu.memory_space<vmem>>, %arg7: memref<1x2x32xf32, #tpu.memory_space<vmem>>, %arg8: memref<1x2x32xf32, #tpu.memory_space<vmem>>, %arg9: memref<2x32xf32, #tpu.memory_space<vmem>>, %arg10: memref<2x32xf32, #tpu.memory_space<vmem>>) attributes {dimension_semantics = [#tpu.dimension_semantics<parallel>, #tpu.dimension_semantics<arbitrary>], iteration_bounds = array<i64: 1, 1>, scalar_prefetch = 0 : i64, scratch_operands = 2 : i64, tpu.core_type = #tpu.core_type<tc>, window_params = [{transform_indices = @transform_0, window_bounds = array<i64: 8, 2, 128>}, {transform_indices = @transform_1, window_bounds = array<i64: 1, 2, 32>}, {transform_indices = @transform_2, window_bounds = array<i64: 1, 2, 32>}, {pipeline_mode = #tpu.pipeline_mode<synchronous>, transform_indices = @transform_3, window_bounds = array<i64: 32, 128>}, {transform_indices = @transform_4, window_bounds = array<i64: 8, 2, 32>}, {transform_indices = @transform_5, window_bounds = array<i64: 1, 2, 32>}, {transform_indices = @transform_6, window_bounds = array<i64: 1, 2, 32>}]} {
    %c0_i32 = arith.constant 0 : i32
    %0 = arith.cmpi eq, %arg1, %c0_i32 : i32
    %1 = arith.extui %0 : i1 to i32
    %c0_i32_0 = arith.constant 0 : i32
    %2 = arith.cmpi ne, %1, %c0_i32_0 : i32
    scf.if %2 {
      %c0_90 = arith.constant 0 : index
      %c0_91 = arith.constant 0 : index
      %c0_92 = arith.constant 0 : index
      %314 = vector.load %arg3[%c0_90, %c0_91, %c0_92] : memref<1x2x32xf32, #tpu.memory_space<vmem>>, vector<1x2x32xf32>
      %315 = vector.shape_cast %314 : vector<1x2x32xf32> to vector<2x32xf32>
      %c0_93 = arith.constant 0 : index
      %c0_94 = arith.constant 0 : index
      %316 = vector.load %arg9[%c0_93, %c0_94] : memref<2x32xf32, #tpu.memory_space<vmem>>, vector<2x32xf32>
      tpu.vector_store %arg9[%c0_93, %c0_94], %315 {strides = array<i32>} : memref<2x32xf32, #tpu.memory_space<vmem>>, vector<2x32xf32>,
      %c0_95 = arith.constant 0 : index
      %c0_96 = arith.constant 0 : index
      %c0_97 = arith.constant 0 : index
      %317 = vector.load %arg4[%c0_95, %c0_96, %c0_97] : memref<1x2x32xf32, #tpu.memory_space<vmem>>, vector<1x2x32xf32>
      %318 = vector.shape_cast %317 : vector<1x2x32xf32> to vector<2x32xf32>
      %c0_98 = arith.constant 0 : index
      %c0_99 = arith.constant 0 : index
      %319 = vector.load %arg10[%c0_98, %c0_99] : memref<2x32xf32, #tpu.memory_space<vmem>>, vector<2x32xf32>
      tpu.vector_store %arg10[%c0_98, %c0_99], %318 {strides = array<i32>} : memref<2x32xf32, #tpu.memory_space<vmem>>, vector<2x32xf32>,
    } else {
    }
    %c0 = arith.constant 0 : index
    %c0_1 = arith.constant 0 : index
    %3 = vector.load %arg9[%c0, %c0_1] : memref<2x32xf32, #tpu.memory_space<vmem>>, vector<2x32xf32>
    %c0_2 = arith.constant 0 : index
    %c0_3 = arith.constant 0 : index
    %4 = vector.load %arg10[%c0_2, %c0_3] : memref<2x32xf32, #tpu.memory_space<vmem>>, vector<2x32xf32>
    %c0_i32_4 = arith.constant 0 : i32
    %5 = arith.index_cast %c0_i32_4 : i32 to index
    %c0_5 = arith.constant 0 : index
    %c0_6 = arith.constant 0 : index
    %6 = vector.load %arg2[%5, %c0_5, %c0_6] : memref<8x2x128xbf16, #tpu.memory_space<vmem>>, vector<1x2x128xbf16>
    %7 = vector.shape_cast %6 : vector<1x2x128xbf16> to vector<2x128xbf16>
    %8 = arith.extf %7 : vector<2x128xbf16> to vector<2x128xf32>
    %9 = arith.truncf %3 : vector<2x32xf32> to vector<2x32xbf16>
    %c0_7 = arith.constant 0 : index
    %c0_8 = arith.constant 0 : index
    %10 = vector.load %arg5[%c0_7, %c0_8] : memref<32x128xbf16, #tpu.memory_space<vmem>>, vector<32x128xbf16>
    %cst = arith.constant dense<0.000000e+00> : vector<2x128xf32>
    %11 = tpu.matmul %9, %10, %cst {dimension_numbers = #tpu.dot_dimension_numbers<[1], [0], [0], [1], [0, 0, 1, 1], [], []>} : vector<2x32xbf16>, vector<32x128xbf16>, vector<2x128xf32> -> vector<2x128xf32>
    %12 = arith.addf %8, %11 : vector<2x128xf32>
    %13 = vector.extract_strided_slice %12 {offsets = [0, 0], sizes = [2, 32], strides = [1, 1]} : vector<2x128xf32> to vector<2x32xf32>
    %14 = arith.negf %13 : vector<2x32xf32>
    %15 = math.exp %14 : vector<2x32xf32>
    %cst_9 = arith.constant 1.000000e+00 : f32
    %16 = vector.broadcast %cst_9 : f32 to vector<2x32xf32>
    %17 = arith.addf %16, %15 : vector<2x32xf32>
    %18 = arith.divf %16, %17 : vector<2x32xf32>
    %19 = vector.extract_strided_slice %12 {offsets = [0, 32], sizes = [2, 32], strides = [1, 1]} : vector<2x128xf32> to vector<2x32xf32>
    %20 = arith.negf %19 : vector<2x32xf32>
    %21 = math.exp %20 : vector<2x32xf32>
    %cst_10 = arith.constant 1.000000e+00 : f32
    %22 = vector.broadcast %cst_10 : f32 to vector<2x32xf32>
    %23 = arith.addf %22, %21 : vector<2x32xf32>
    %24 = arith.divf %22, %23 : vector<2x32xf32>
    %25 = vector.extract_strided_slice %12 {offsets = [0, 64], sizes = [2, 32], strides = [1, 1]} : vector<2x128xf32> to vector<2x32xf32>
    %26 = math.tanh %25 : vector<2x32xf32>
    %27 = vector.extract_strided_slice %12 {offsets = [0, 96], sizes = [2, 32], strides = [1, 1]} : vector<2x128xf32> to vector<2x32xf32>
    %28 = arith.negf %27 : vector<2x32xf32>
    %29 = math.exp %28 : vector<2x32xf32>
    %cst_11 = arith.constant 1.000000e+00 : f32
    %30 = vector.broadcast %cst_11 : f32 to vector<2x32xf32>
    %31 = arith.addf %30, %29 : vector<2x32xf32>
    %32 = arith.divf %30, %31 : vector<2x32xf32>
    %33 = arith.mulf %24, %4 : vector<2x32xf32>
    %34 = arith.mulf %18, %26 : vector<2x32xf32>
    %35 = arith.addf %33, %34 : vector<2x32xf32>
    %36 = math.tanh %35 : vector<2x32xf32>
    %37 = arith.mulf %32, %36 : vector<2x32xf32>
    %38 = arith.truncf %37 : vector<2x32xf32> to vector<2x32xbf16>
    %39 = arith.index_cast %c0_i32_4 : i32 to index
    %c0_12 = arith.constant 0 : index
    %c0_13 = arith.constant 0 : index
    %40 = vector.load %arg6[%39, %c0_12, %c0_13] : memref<8x2x32xbf16, #tpu.memory_space<vmem>>, vector<1x2x32xbf16>
    %41 = vector.shape_cast %40 : vector<1x2x32xbf16> to vector<2x32xbf16>
    %42 = vector.shape_cast %38 : vector<2x32xbf16> to vector<1x2x32xbf16>
    tpu.vector_store %arg6[%39, %c0_12, %c0_13], %42 {strides = array<i32>} : memref<8x2x32xbf16, #tpu.memory_space<vmem>>, vector<1x2x32xbf16>,
    %c1_i32 = arith.constant 1 : i32
    %43 = arith.index_cast %c1_i32 : i32 to index
    %c0_14 = arith.constant 0 : index
    %c0_15 = arith.constant 0 : index
    %44 = vector.load %arg2[%43, %c0_14, %c0_15] : memref<8x2x128xbf16, #tpu.memory_space<vmem>>, vector<1x2x128xbf16>
    %45 = vector.shape_cast %44 : vector<1x2x128xbf16> to vector<2x128xbf16>
    %46 = arith.extf %45 : vector<2x128xbf16> to vector<2x128xf32>
    %47 = arith.truncf %37 : vector<2x32xf32> to vector<2x32xbf16>
    %c0_16 = arith.constant 0 : index
    %c0_17 = arith.constant 0 : index
    %48 = vector.load %arg5[%c0_16, %c0_17] : memref<32x128xbf16, #tpu.memory_space<vmem>>, vector<32x128xbf16>
    %cst_18 = arith.constant dense<0.000000e+00> : vector<2x128xf32>
    %49 = tpu.matmul %47, %48, %cst_18 {dimension_numbers = #tpu.dot_dimension_numbers<[1], [0], [0], [1], [0, 0, 1, 1], [], []>} : vector<2x32xbf16>, vector<32x128xbf16>, vector<2x128xf32> -> vector<2x128xf32>
    %50 = arith.addf %46, %49 : vector<2x128xf32>
    %51 = vector.extract_strided_slice %50 {offsets = [0, 0], sizes = [2, 32], strides = [1, 1]} : vector<2x128xf32> to vector<2x32xf32>
    %52 = arith.negf %51 : vector<2x32xf32>
    %53 = math.exp %52 : vector<2x32xf32>
    %cst_19 = arith.constant 1.000000e+00 : f32
    %54 = vector.broadcast %cst_19 : f32 to vector<2x32xf32>
    %55 = arith.addf %54, %53 : vector<2x32xf32>
    %56 = arith.divf %54, %55 : vector<2x32xf32>
    %57 = vector.extract_strided_slice %50 {offsets = [0, 32], sizes = [2, 32], strides = [1, 1]} : vector<2x128xf32> to vector<2x32xf32>
    %58 = arith.negf %57 : vector<2x32xf32>
    %59 = math.exp %58 : vector<2x32xf32>
    %cst_20 = arith.constant 1.000000e+00 : f32
    %60 = vector.broadcast %cst_20 : f32 to vector<2x32xf32>
    %61 = arith.addf %60, %59 : vector<2x32xf32>
    %62 = arith.divf %60, %61 : vector<2x32xf32>
    %63 = vector.extract_strided_slice %50 {offsets = [0, 64], sizes = [2, 32], strides = [1, 1]} : vector<2x128xf32> to vector<2x32xf32>
    %64 = math.tanh %63 : vector<2x32xf32>
    %65 = vector.extract_strided_slice %50 {offsets = [0, 96], sizes = [2, 32], strides = [1, 1]} : vector<2x128xf32> to vector<2x32xf32>
    %66 = arith.negf %65 : vector<2x32xf32>
    %67 = math.exp %66 : vector<2x32xf32>
    %cst_21 = arith.constant 1.000000e+00 : f32
    %68 = vector.broadcast %cst_21 : f32 to vector<2x32xf32>
    %69 = arith.addf %68, %67 : vector<2x32xf32>
    %70 = arith.divf %68, %69 : vector<2x32xf32>
    %71 = arith.mulf %62, %35 : vector<2x32xf32>
    %72 = arith.mulf %56, %64 : vector<2x32xf32>
    %73 = arith.addf %71, %72 : vector<2x32xf32>
    %74 = math.tanh %73 : vector<2x32xf32>
    %75 = arith.mulf %70, %74 : vector<2x32xf32>
    %76 = arith.truncf %75 : vector<2x32xf32> to vector<2x32xbf16>
    %77 = arith.index_cast %c1_i32 : i32 to index
    %c0_22 = arith.constant 0 : index
    %c0_23 = arith.constant 0 : index
    %78 = vector.load %arg6[%77, %c0_22, %c0_23] : memref<8x2x32xbf16, #tpu.memory_space<vmem>>, vector<1x2x32xbf16>
    %79 = vector.shape_cast %78 : vector<1x2x32xbf16> to vector<2x32xbf16>
    %80 = vector.shape_cast %76 : vector<2x32xbf16> to vector<1x2x32xbf16>
    tpu.vector_store %arg6[%77, %c0_22, %c0_23], %80 {strides = array<i32>} : memref<8x2x32xbf16, #tpu.memory_space<vmem>>, vector<1x2x32xbf16>,
    %c2_i32 = arith.constant 2 : i32
    %81 = arith.index_cast %c2_i32 : i32 to index
    %c0_24 = arith.constant 0 : index
    %c0_25 = arith.constant 0 : index
    %82 = vector.load %arg2[%81, %c0_24, %c0_25] : memref<8x2x128xbf16, #tpu.memory_space<vmem>>, vector<1x2x128xbf16>
    %83 = vector.shape_cast %82 : vector<1x2x128xbf16> to vector<2x128xbf16>
    %84 = arith.extf %83 : vector<2x128xbf16> to vector<2x128xf32>
    %85 = arith.truncf %75 : vector<2x32xf32> to vector<2x32xbf16>
    %c0_26 = arith.constant 0 : index
    %c0_27 = arith.constant 0 : index
    %86 = vector.load %arg5[%c0_26, %c0_27] : memref<32x128xbf16, #tpu.memory_space<vmem>>, vector<32x128xbf16>
    %cst_28 = arith.constant dense<0.000000e+00> : vector<2x128xf32>
    %87 = tpu.matmul %85, %86, %cst_28 {dimension_numbers = #tpu.dot_dimension_numbers<[1], [0], [0], [1], [0, 0, 1, 1], [], []>} : vector<2x32xbf16>, vector<32x128xbf16>, vector<2x128xf32> -> vector<2x128xf32>
    %88 = arith.addf %84, %87 : vector<2x128xf32>
    %89 = vector.extract_strided_slice %88 {offsets = [0, 0], sizes = [2, 32], strides = [1, 1]} : vector<2x128xf32> to vector<2x32xf32>
    %90 = arith.negf %89 : vector<2x32xf32>
    %91 = math.exp %90 : vector<2x32xf32>
    %cst_29 = arith.constant 1.000000e+00 : f32
    %92 = vector.broadcast %cst_29 : f32 to vector<2x32xf32>
    %93 = arith.addf %92, %91 : vector<2x32xf32>
    %94 = arith.divf %92, %93 : vector<2x32xf32>
    %95 = vector.extract_strided_slice %88 {offsets = [0, 32], sizes = [2, 32], strides = [1, 1]} : vector<2x128xf32> to vector<2x32xf32>
    %96 = arith.negf %95 : vector<2x32xf32>
    %97 = math.exp %96 : vector<2x32xf32>
    %cst_30 = arith.constant 1.000000e+00 : f32
    %98 = vector.broadcast %cst_30 : f32 to vector<2x32xf32>
    %99 = arith.addf %98, %97 : vector<2x32xf32>
    %100 = arith.divf %98, %99 : vector<2x32xf32>
    %101 = vector.extract_strided_slice %88 {offsets = [0, 64], sizes = [2, 32], strides = [1, 1]} : vector<2x128xf32> to vector<2x32xf32>
    %102 = math.tanh %101 : vector<2x32xf32>
    %103 = vector.extract_strided_slice %88 {offsets = [0, 96], sizes = [2, 32], strides = [1, 1]} : vector<2x128xf32> to vector<2x32xf32>
    %104 = arith.negf %103 : vector<2x32xf32>
    %105 = math.exp %104 : vector<2x32xf32>
    %cst_31 = arith.constant 1.000000e+00 : f32
    %106 = vector.broadcast %cst_31 : f32 to vector<2x32xf32>
    %107 = arith.addf %106, %105 : vector<2x32xf32>
    %108 = arith.divf %106, %107 : vector<2x32xf32>
    %109 = arith.mulf %100, %73 : vector<2x32xf32>
    %110 = arith.mulf %94, %102 : vector<2x32xf32>
    %111 = arith.addf %109, %110 : vector<2x32xf32>
    %112 = math.tanh %111 : vector<2x32xf32>
    %113 = arith.mulf %108, %112 : vector<2x32xf32>
    %114 = arith.truncf %113 : vector<2x32xf32> to vector<2x32xbf16>
    %115 = arith.index_cast %c2_i32 : i32 to index
    %c0_32 = arith.constant 0 : index
    %c0_33 = arith.constant 0 : index
    %116 = vector.load %arg6[%115, %c0_32, %c0_33] : memref<8x2x32xbf16, #tpu.memory_space<vmem>>, vector<1x2x32xbf16>
    %117 = vector.shape_cast %116 : vector<1x2x32xbf16> to vector<2x32xbf16>
    %118 = vector.shape_cast %114 : vector<2x32xbf16> to vector<1x2x32xbf16>
    tpu.vector_store %arg6[%115, %c0_32, %c0_33], %118 {strides = array<i32>} : memref<8x2x32xbf16, #tpu.memory_space<vmem>>, vector<1x2x32xbf16>,
    %c3_i32 = arith.constant 3 : i32
    %119 = arith.index_cast %c3_i32 : i32 to index
    %c0_34 = arith.constant 0 : index
    %c0_35 = arith.constant 0 : index
    %120 = vector.load %arg2[%119, %c0_34, %c0_35] : memref<8x2x128xbf16, #tpu.memory_space<vmem>>, vector<1x2x128xbf16>
    %121 = vector.shape_cast %120 : vector<1x2x128xbf16> to vector<2x128xbf16>
    %122 = arith.extf %121 : vector<2x128xbf16> to vector<2x128xf32>
    %123 = arith.truncf %113 : vector<2x32xf32> to vector<2x32xbf16>
    %c0_36 = arith.constant 0 : index
    %c0_37 = arith.constant 0 : index
    %124 = vector.load %arg5[%c0_36, %c0_37] : memref<32x128xbf16, #tpu.memory_space<vmem>>, vector<32x128xbf16>
    %cst_38 = arith.constant dense<0.000000e+00> : vector<2x128xf32>
    %125 = tpu.matmul %123, %124, %cst_38 {dimension_numbers = #tpu.dot_dimension_numbers<[1], [0], [0], [1], [0, 0, 1, 1], [], []>} : vector<2x32xbf16>, vector<32x128xbf16>, vector<2x128xf32> -> vector<2x128xf32>
    %126 = arith.addf %122, %125 : vector<2x128xf32>
    %127 = vector.extract_strided_slice %126 {offsets = [0, 0], sizes = [2, 32], strides = [1, 1]} : vector<2x128xf32> to vector<2x32xf32>
    %128 = arith.negf %127 : vector<2x32xf32>
    %129 = math.exp %128 : vector<2x32xf32>
    %cst_39 = arith.constant 1.000000e+00 : f32
    %130 = vector.broadcast %cst_39 : f32 to vector<2x32xf32>
    %131 = arith.addf %130, %129 : vector<2x32xf32>
    %132 = arith.divf %130, %131 : vector<2x32xf32>
    %133 = vector.extract_strided_slice %126 {offsets = [0, 32], sizes = [2, 32], strides = [1, 1]} : vector<2x128xf32> to vector<2x32xf32>
    %134 = arith.negf %133 : vector<2x32xf32>
    %135 = math.exp %134 : vector<2x32xf32>
    %cst_40 = arith.constant 1.000000e+00 : f32
    %136 = vector.broadcast %cst_40 : f32 to vector<2x32xf32>
    %137 = arith.addf %136, %135 : vector<2x32xf32>
    %138 = arith.divf %136, %137 : vector<2x32xf32>
    %139 = vector.extract_strided_slice %126 {offsets = [0, 64], sizes = [2, 32], strides = [1, 1]} : vector<2x128xf32> to vector<2x32xf32>
    %140 = math.tanh %139 : vector<2x32xf32>
    %141 = vector.extract_strided_slice %126 {offsets = [0, 96], sizes = [2, 32], strides = [1, 1]} : vector<2x128xf32> to vector<2x32xf32>
    %142 = arith.negf %141 : vector<2x32xf32>
    %143 = math.exp %142 : vector<2x32xf32>
    %cst_41 = arith.constant 1.000000e+00 : f32
    %144 = vector.broadcast %cst_41 : f32 to vector<2x32xf32>
    %145 = arith.addf %144, %143 : vector<2x32xf32>
    %146 = arith.divf %144, %145 : vector<2x32xf32>
    %147 = arith.mulf %138, %111 : vector<2x32xf32>
    %148 = arith.mulf %132, %140 : vector<2x32xf32>
    %149 = arith.addf %147, %148 : vector<2x32xf32>
    %150 = math.tanh %149 : vector<2x32xf32>
    %151 = arith.mulf %146, %150 : vector<2x32xf32>
    %152 = arith.truncf %151 : vector<2x32xf32> to vector<2x32xbf16>
    %153 = arith.index_cast %c3_i32 : i32 to index
    %c0_42 = arith.constant 0 : index
    %c0_43 = arith.constant 0 : index
    %154 = vector.load %arg6[%153, %c0_42, %c0_43] : memref<8x2x32xbf16, #tpu.memory_space<vmem>>, vector<1x2x32xbf16>
    %155 = vector.shape_cast %154 : vector<1x2x32xbf16> to vector<2x32xbf16>
    %156 = vector.shape_cast %152 : vector<2x32xbf16> to vector<1x2x32xbf16>
    tpu.vector_store %arg6[%153, %c0_42, %c0_43], %156 {strides = array<i32>} : memref<8x2x32xbf16, #tpu.memory_space<vmem>>, vector<1x2x32xbf16>,
    %c4_i32 = arith.constant 4 : i32
    %157 = arith.index_cast %c4_i32 : i32 to index
    %c0_44 = arith.constant 0 : index
    %c0_45 = arith.constant 0 : index
    %158 = vector.load %arg2[%157, %c0_44, %c0_45] : memref<8x2x128xbf16, #tpu.memory_space<vmem>>, vector<1x2x128xbf16>
    %159 = vector.shape_cast %158 : vector<1x2x128xbf16> to vector<2x128xbf16>
    %160 = arith.extf %159 : vector<2x128xbf16> to vector<2x128xf32>
    %161 = arith.truncf %151 : vector<2x32xf32> to vector<2x32xbf16>
    %c0_46 = arith.constant 0 : index
    %c0_47 = arith.constant 0 : index
    %162 = vector.load %arg5[%c0_46, %c0_47] : memref<32x128xbf16, #tpu.memory_space<vmem>>, vector<32x128xbf16>
    %cst_48 = arith.constant dense<0.000000e+00> : vector<2x128xf32>
    %163 = tpu.matmul %161, %162, %cst_48 {dimension_numbers = #tpu.dot_dimension_numbers<[1], [0], [0], [1], [0, 0, 1, 1], [], []>} : vector<2x32xbf16>, vector<32x128xbf16>, vector<2x128xf32> -> vector<2x128xf32>
    %164 = arith.addf %160, %163 : vector<2x128xf32>
    %165 = vector.extract_strided_slice %164 {offsets = [0, 0], sizes = [2, 32], strides = [1, 1]} : vector<2x128xf32> to vector<2x32xf32>
    %166 = arith.negf %165 : vector<2x32xf32>
    %167 = math.exp %166 : vector<2x32xf32>
    %cst_49 = arith.constant 1.000000e+00 : f32
    %168 = vector.broadcast %cst_49 : f32 to vector<2x32xf32>
    %169 = arith.addf %168, %167 : vector<2x32xf32>
    %170 = arith.divf %168, %169 : vector<2x32xf32>
    %171 = vector.extract_strided_slice %164 {offsets = [0, 32], sizes = [2, 32], strides = [1, 1]} : vector<2x128xf32> to vector<2x32xf32>
    %172 = arith.negf %171 : vector<2x32xf32>
    %173 = math.exp %172 : vector<2x32xf32>
    %cst_50 = arith.constant 1.000000e+00 : f32
    %174 = vector.broadcast %cst_50 : f32 to vector<2x32xf32>
    %175 = arith.addf %174, %173 : vector<2x32xf32>
    %176 = arith.divf %174, %175 : vector<2x32xf32>
    %177 = vector.extract_strided_slice %164 {offsets = [0, 64], sizes = [2, 32], strides = [1, 1]} : vector<2x128xf32> to vector<2x32xf32>
    %178 = math.tanh %177 : vector<2x32xf32>
    %179 = vector.extract_strided_slice %164 {offsets = [0, 96], sizes = [2, 32], strides = [1, 1]} : vector<2x128xf32> to vector<2x32xf32>
    %180 = arith.negf %179 : vector<2x32xf32>
    %181 = math.exp %180 : vector<2x32xf32>
    %cst_51 = arith.constant 1.000000e+00 : f32
    %182 = vector.broadcast %cst_51 : f32 to vector<2x32xf32>
    %183 = arith.addf %182, %181 : vector<2x32xf32>
    %184 = arith.divf %182, %183 : vector<2x32xf32>
    %185 = arith.mulf %176, %149 : vector<2x32xf32>
    %186 = arith.mulf %170, %178 : vector<2x32xf32>
    %187 = arith.addf %185, %186 : vector<2x32xf32>
    %188 = math.tanh %187 : vector<2x32xf32>
    %189 = arith.mulf %184, %188 : vector<2x32xf32>
    %190 = arith.truncf %189 : vector<2x32xf32> to vector<2x32xbf16>
    %191 = arith.index_cast %c4_i32 : i32 to index
    %c0_52 = arith.constant 0 : index
    %c0_53 = arith.constant 0 : index
    %192 = vector.load %arg6[%191, %c0_52, %c0_53] : memref<8x2x32xbf16, #tpu.memory_space<vmem>>, vector<1x2x32xbf16>
    %193 = vector.shape_cast %192 : vector<1x2x32xbf16> to vector<2x32xbf16>
    %194 = vector.shape_cast %190 : vector<2x32xbf16> to vector<1x2x32xbf16>
    tpu.vector_store %arg6[%191, %c0_52, %c0_53], %194 {strides = array<i32>} : memref<8x2x32xbf16, #tpu.memory_space<vmem>>, vector<1x2x32xbf16>,
    %c5_i32 = arith.constant 5 : i32
    %195 = arith.index_cast %c5_i32 : i32 to index
    %c0_54 = arith.constant 0 : index
    %c0_55 = arith.constant 0 : index
    %196 = vector.load %arg2[%195, %c0_54, %c0_55] : memref<8x2x128xbf16, #tpu.memory_space<vmem>>, vector<1x2x128xbf16>
    %197 = vector.shape_cast %196 : vector<1x2x128xbf16> to vector<2x128xbf16>
    %198 = arith.extf %197 : vector<2x128xbf16> to vector<2x128xf32>
    %199 = arith.truncf %189 : vector<2x32xf32> to vector<2x32xbf16>
    %c0_56 = arith.constant 0 : index
    %c0_57 = arith.constant 0 : index
    %200 = vector.load %arg5[%c0_56, %c0_57] : memref<32x128xbf16, #tpu.memory_space<vmem>>, vector<32x128xbf16>
    %cst_58 = arith.constant dense<0.000000e+00> : vector<2x128xf32>
    %201 = tpu.matmul %199, %200, %cst_58 {dimension_numbers = #tpu.dot_dimension_numbers<[1], [0], [0], [1], [0, 0, 1, 1], [], []>} : vector<2x32xbf16>, vector<32x128xbf16>, vector<2x128xf32> -> vector<2x128xf32>
    %202 = arith.addf %198, %201 : vector<2x128xf32>
    %203 = vector.extract_strided_slice %202 {offsets = [0, 0], sizes = [2, 32], strides = [1, 1]} : vector<2x128xf32> to vector<2x32xf32>
    %204 = arith.negf %203 : vector<2x32xf32>
    %205 = math.exp %204 : vector<2x32xf32>
    %cst_59 = arith.constant 1.000000e+00 : f32
    %206 = vector.broadcast %cst_59 : f32 to vector<2x32xf32>
    %207 = arith.addf %206, %205 : vector<2x32xf32>
    %208 = arith.divf %206, %207 : vector<2x32xf32>
    %209 = vector.extract_strided_slice %202 {offsets = [0, 32], sizes = [2, 32], strides = [1, 1]} : vector<2x128xf32> to vector<2x32xf32>
    %210 = arith.negf %209 : vector<2x32xf32>
    %211 = math.exp %210 : vector<2x32xf32>
    %cst_60 = arith.constant 1.000000e+00 : f32
    %212 = vector.broadcast %cst_60 : f32 to vector<2x32xf32>
    %213 = arith.addf %212, %211 : vector<2x32xf32>
    %214 = arith.divf %212, %213 : vector<2x32xf32>
    %215 = vector.extract_strided_slice %202 {offsets = [0, 64], sizes = [2, 32], strides = [1, 1]} : vector<2x128xf32> to vector<2x32xf32>
    %216 = math.tanh %215 : vector<2x32xf32>
    %217 = vector.extract_strided_slice %202 {offsets = [0, 96], sizes = [2, 32], strides = [1, 1]} : vector<2x128xf32> to vector<2x32xf32>
    %218 = arith.negf %217 : vector<2x32xf32>
    %219 = math.exp %218 : vector<2x32xf32>
    %cst_61 = arith.constant 1.000000e+00 : f32
    %220 = vector.broadcast %cst_61 : f32 to vector<2x32xf32>
    %221 = arith.addf %220, %219 : vector<2x32xf32>
    %222 = arith.divf %220, %221 : vector<2x32xf32>
    %223 = arith.mulf %214, %187 : vector<2x32xf32>
    %224 = arith.mulf %208, %216 : vector<2x32xf32>
    %225 = arith.addf %223, %224 : vector<2x32xf32>
    %226 = math.tanh %225 : vector<2x32xf32>
    %227 = arith.mulf %222, %226 : vector<2x32xf32>
    %228 = arith.truncf %227 : vector<2x32xf32> to vector<2x32xbf16>
    %229 = arith.index_cast %c5_i32 : i32 to index
    %c0_62 = arith.constant 0 : index
    %c0_63 = arith.constant 0 : index
    %230 = vector.load %arg6[%229, %c0_62, %c0_63] : memref<8x2x32xbf16, #tpu.memory_space<vmem>>, vector<1x2x32xbf16>
    %231 = vector.shape_cast %230 : vector<1x2x32xbf16> to vector<2x32xbf16>
    %232 = vector.shape_cast %228 : vector<2x32xbf16> to vector<1x2x32xbf16>
    tpu.vector_store %arg6[%229, %c0_62, %c0_63], %232 {strides = array<i32>} : memref<8x2x32xbf16, #tpu.memory_space<vmem>>, vector<1x2x32xbf16>,
    %c6_i32 = arith.constant 6 : i32
    %233 = arith.index_cast %c6_i32 : i32 to index
    %c0_64 = arith.constant 0 : index
    %c0_65 = arith.constant 0 : index
    %234 = vector.load %arg2[%233, %c0_64, %c0_65] : memref<8x2x128xbf16, #tpu.memory_space<vmem>>, vector<1x2x128xbf16>
    %235 = vector.shape_cast %234 : vector<1x2x128xbf16> to vector<2x128xbf16>
    %236 = arith.extf %235 : vector<2x128xbf16> to vector<2x128xf32>
    %237 = arith.truncf %227 : vector<2x32xf32> to vector<2x32xbf16>
    %c0_66 = arith.constant 0 : index
    %c0_67 = arith.constant 0 : index
    %238 = vector.load %arg5[%c0_66, %c0_67] : memref<32x128xbf16, #tpu.memory_space<vmem>>, vector<32x128xbf16>
    %cst_68 = arith.constant dense<0.000000e+00> : vector<2x128xf32>
    %239 = tpu.matmul %237, %238, %cst_68 {dimension_numbers = #tpu.dot_dimension_numbers<[1], [0], [0], [1], [0, 0, 1, 1], [], []>} : vector<2x32xbf16>, vector<32x128xbf16>, vector<2x128xf32> -> vector<2x128xf32>
    %240 = arith.addf %236, %239 : vector<2x128xf32>
    %241 = vector.extract_strided_slice %240 {offsets = [0, 0], sizes = [2, 32], strides = [1, 1]} : vector<2x128xf32> to vector<2x32xf32>
    %242 = arith.negf %241 : vector<2x32xf32>
    %243 = math.exp %242 : vector<2x32xf32>
    %cst_69 = arith.constant 1.000000e+00 : f32
    %244 = vector.broadcast %cst_69 : f32 to vector<2x32xf32>
    %245 = arith.addf %244, %243 : vector<2x32xf32>
    %246 = arith.divf %244, %245 : vector<2x32xf32>
    %247 = vector.extract_strided_slice %240 {offsets = [0, 32], sizes = [2, 32], strides = [1, 1]} : vector<2x128xf32> to vector<2x32xf32>
    %248 = arith.negf %247 : vector<2x32xf32>
    %249 = math.exp %248 : vector<2x32xf32>
    %cst_70 = arith.constant 1.000000e+00 : f32
    %250 = vector.broadcast %cst_70 : f32 to vector<2x32xf32>
    %251 = arith.addf %250, %249 : vector<2x32xf32>
    %252 = arith.divf %250, %251 : vector<2x32xf32>
    %253 = vector.extract_strided_slice %240 {offsets = [0, 64], sizes = [2, 32], strides = [1, 1]} : vector<2x128xf32> to vector<2x32xf32>
    %254 = math.tanh %253 : vector<2x32xf32>
    %255 = vector.extract_strided_slice %240 {offsets = [0, 96], sizes = [2, 32], strides = [1, 1]} : vector<2x128xf32> to vector<2x32xf32>
    %256 = arith.negf %255 : vector<2x32xf32>
    %257 = math.exp %256 : vector<2x32xf32>
    %cst_71 = arith.constant 1.000000e+00 : f32
    %258 = vector.broadcast %cst_71 : f32 to vector<2x32xf32>
    %259 = arith.addf %258, %257 : vector<2x32xf32>
    %260 = arith.divf %258, %259 : vector<2x32xf32>
    %261 = arith.mulf %252, %225 : vector<2x32xf32>
    %262 = arith.mulf %246, %254 : vector<2x32xf32>
    %263 = arith.addf %261, %262 : vector<2x32xf32>
    %264 = math.tanh %263 : vector<2x32xf32>
    %265 = arith.mulf %260, %264 : vector<2x32xf32>
    %266 = arith.truncf %265 : vector<2x32xf32> to vector<2x32xbf16>
    %267 = arith.index_cast %c6_i32 : i32 to index
    %c0_72 = arith.constant 0 : index
    %c0_73 = arith.constant 0 : index
    %268 = vector.load %arg6[%267, %c0_72, %c0_73] : memref<8x2x32xbf16, #tpu.memory_space<vmem>>, vector<1x2x32xbf16>
    %269 = vector.shape_cast %268 : vector<1x2x32xbf16> to vector<2x32xbf16>
    %270 = vector.shape_cast %266 : vector<2x32xbf16> to vector<1x2x32xbf16>
    tpu.vector_store %arg6[%267, %c0_72, %c0_73], %270 {strides = array<i32>} : memref<8x2x32xbf16, #tpu.memory_space<vmem>>, vector<1x2x32xbf16>,
    %c7_i32 = arith.constant 7 : i32
    %271 = arith.index_cast %c7_i32 : i32 to index
    %c0_74 = arith.constant 0 : index
    %c0_75 = arith.constant 0 : index
    %272 = vector.load %arg2[%271, %c0_74, %c0_75] : memref<8x2x128xbf16, #tpu.memory_space<vmem>>, vector<1x2x128xbf16>
    %273 = vector.shape_cast %272 : vector<1x2x128xbf16> to vector<2x128xbf16>
    %274 = arith.extf %273 : vector<2x128xbf16> to vector<2x128xf32>
    %275 = arith.truncf %265 : vector<2x32xf32> to vector<2x32xbf16>
    %c0_76 = arith.constant 0 : index
    %c0_77 = arith.constant 0 : index
    %276 = vector.load %arg5[%c0_76, %c0_77] : memref<32x128xbf16, #tpu.memory_space<vmem>>, vector<32x128xbf16>
    %cst_78 = arith.constant dense<0.000000e+00> : vector<2x128xf32>
    %277 = tpu.matmul %275, %276, %cst_78 {dimension_numbers = #tpu.dot_dimension_numbers<[1], [0], [0], [1], [0, 0, 1, 1], [], []>} : vector<2x32xbf16>, vector<32x128xbf16>, vector<2x128xf32> -> vector<2x128xf32>
    %278 = arith.addf %274, %277 : vector<2x128xf32>
    %279 = vector.extract_strided_slice %278 {offsets = [0, 0], sizes = [2, 32], strides = [1, 1]} : vector<2x128xf32> to vector<2x32xf32>
    %280 = arith.negf %279 : vector<2x32xf32>
    %281 = math.exp %280 : vector<2x32xf32>
    %cst_79 = arith.constant 1.000000e+00 : f32
    %282 = vector.broadcast %cst_79 : f32 to vector<2x32xf32>
    %283 = arith.addf %282, %281 : vector<2x32xf32>
    %284 = arith.divf %282, %283 : vector<2x32xf32>
    %285 = vector.extract_strided_slice %278 {offsets = [0, 32], sizes = [2, 32], strides = [1, 1]} : vector<2x128xf32> to vector<2x32xf32>
    %286 = arith.negf %285 : vector<2x32xf32>
    %287 = math.exp %286 : vector<2x32xf32>
    %cst_80 = arith.constant 1.000000e+00 : f32
    %288 = vector.broadcast %cst_80 : f32 to vector<2x32xf32>
    %289 = arith.addf %288, %287 : vector<2x32xf32>
    %290 = arith.divf %288, %289 : vector<2x32xf32>
    %291 = vector.extract_strided_slice %278 {offsets = [0, 64], sizes = [2, 32], strides = [1, 1]} : vector<2x128xf32> to vector<2x32xf32>
    %292 = math.tanh %291 : vector<2x32xf32>
    %293 = vector.extract_strided_slice %278 {offsets = [0, 96], sizes = [2, 32], strides = [1, 1]} : vector<2x128xf32> to vector<2x32xf32>
    %294 = arith.negf %293 : vector<2x32xf32>
    %295 = math.exp %294 : vector<2x32xf32>
    %cst_81 = arith.constant 1.000000e+00 : f32
    %296 = vector.broadcast %cst_81 : f32 to vector<2x32xf32>
    %297 = arith.addf %296, %295 : vector<2x32xf32>
    %298 = arith.divf %296, %297 : vector<2x32xf32>
    %299 = arith.mulf %290, %263 : vector<2x32xf32>
    %300 = arith.mulf %284, %292 : vector<2x32xf32>
    %301 = arith.addf %299, %300 : vector<2x32xf32>
    %302 = math.tanh %301 : vector<2x32xf32>
    %303 = arith.mulf %298, %302 : vector<2x32xf32>
    %304 = arith.truncf %303 : vector<2x32xf32> to vector<2x32xbf16>
    %305 = arith.index_cast %c7_i32 : i32 to index
    %c0_82 = arith.constant 0 : index
    %c0_83 = arith.constant 0 : index
    %306 = vector.load %arg6[%305, %c0_82, %c0_83] : memref<8x2x32xbf16, #tpu.memory_space<vmem>>, vector<1x2x32xbf16>
    %307 = vector.shape_cast %306 : vector<1x2x32xbf16> to vector<2x32xbf16>
    %308 = vector.shape_cast %304 : vector<2x32xbf16> to vector<1x2x32xbf16>
    tpu.vector_store %arg6[%305, %c0_82, %c0_83], %308 {strides = array<i32>} : memref<8x2x32xbf16, #tpu.memory_space<vmem>>, vector<1x2x32xbf16>,
    %c8_i32 = arith.constant 8 : i32
    %c0_84 = arith.constant 0 : index
    %c0_85 = arith.constant 0 : index
    %309 = vector.load %arg9[%c0_84, %c0_85] : memref<2x32xf32, #tpu.memory_space<vmem>>, vector<2x32xf32>
    tpu.vector_store %arg9[%c0_84, %c0_85], %303 {strides = array<i32>} : memref<2x32xf32, #tpu.memory_space<vmem>>, vector<2x32xf32>,
    %c0_86 = arith.constant 0 : index
    %c0_87 = arith.constant 0 : index
    %310 = vector.load %arg10[%c0_86, %c0_87] : memref<2x32xf32, #tpu.memory_space<vmem>>, vector<2x32xf32>
    tpu.vector_store %arg10[%c0_86, %c0_87], %301 {strides = array<i32>} : memref<2x32xf32, #tpu.memory_space<vmem>>, vector<2x32xf32>,
    %c0_i32_88 = arith.constant 0 : i32
    %311 = arith.cmpi eq, %arg1, %c0_i32_88 : i32
    %312 = arith.extui %311 : i1 to i32
    %c0_i32_89 = arith.constant 0 : i32
    %313 = arith.cmpi ne, %312, %c0_i32_89 : i32
    scf.if %313 {
      %c0_90 = arith.constant 0 : index
      %c0_91 = arith.constant 0 : index
      %c0_92 = arith.constant 0 : index
      %314 = vector.load %arg7[%c0_90, %c0_91, %c0_92] : memref<1x2x32xf32, #tpu.memory_space<vmem>>, vector<1x2x32xf32>
      %315 = vector.shape_cast %314 : vector<1x2x32xf32> to vector<2x32xf32>
      %316 = vector.shape_cast %303 : vector<2x32xf32> to vector<1x2x32xf32>
      tpu.vector_store %arg7[%c0_90, %c0_91, %c0_92], %316 {strides = array<i32>} : memref<1x2x32xf32, #tpu.memory_space<vmem>>, vector<1x2x32xf32>,
      %c0_93 = arith.constant 0 : index
      %c0_94 = arith.constant 0 : index
      %c0_95 = arith.constant 0 : index
      %317 = vector.load %arg8[%c0_93, %c0_94, %c0_95] : memref<1x2x32xf32, #tpu.memory_space<vmem>>, vector<1x2x32xf32>
      %318 = vector.shape_cast %317 : vector<1x2x32xf32> to vector<2x32xf32>
      %319 = vector.shape_cast %301 : vector<2x32xf32> to vector<1x2x32xf32>
      tpu.vector_store %arg8[%c0_93, %c0_94, %c0_95], %319 {strides = array<i32>} : memref<1x2x32xf32, #tpu.memory_space<vmem>>, vector<1x2x32xf32>,
    } else {
    }
    return
  }
  func.func @transform_0(%arg0: i32, %arg1: i32) -> (i32, i32, i32) {
    %c0_i32 = arith.constant 0 : i32
    %c0_i32_0 = arith.constant 0 : i32
    return %arg1, %arg0, %c0_i32 : i32, i32, i32
  }
  func.func @transform_1(%arg0: i32, %arg1: i32) -> (i32, i32, i32) {
    %c0_i32 = arith.constant 0 : i32
    %c0_i32_0 = arith.constant 0 : i32
    %c0_i32_1 = arith.constant 0 : i32
    return %c0_i32, %arg0, %c0_i32_0 : i32, i32, i32
  }
  func.func @transform_2(%arg0: i32, %arg1: i32) -> (i32, i32, i32) {
    %c0_i32 = arith.constant 0 : i32
    %c0_i32_0 = arith.constant 0 : i32
    %c0_i32_1 = arith.constant 0 : i32
    return %c0_i32, %arg0, %c0_i32_0 : i32, i32, i32
  }
  func.func @transform_3(%arg0: i32, %arg1: i32) -> (i32, i32) {
    %c0_i32 = arith.constant 0 : i32
    %c0_i32_0 = arith.constant 0 : i32
    %c0_i32_1 = arith.constant 0 : i32
    return %c0_i32, %c0_i32_0 : i32, i32
  }
  func.func @transform_4(%arg0: i32, %arg1: i32) -> (i32, i32, i32) {
    %c0_i32 = arith.constant 0 : i32
    %c0_i32_0 = arith.constant 0 : i32
    return %arg1, %arg0, %c0_i32 : i32, i32, i32
  }
  func.func @transform_5(%arg0: i32, %arg1: i32) -> (i32, i32, i32) {
    %c0_i32 = arith.constant 0 : i32
    %c0_i32_0 = arith.constant 0 : i32
    %c0_i32_1 = arith.constant 0 : i32
    return %c0_i32, %arg0, %c0_i32_0 : i32, i32, i32
  }
  func.func @transform_6(%arg0: i32, %arg1: i32) -> (i32, i32, i32) {
    %c0_i32 = arith.constant 0 : i32
    %c0_i32_0 = arith.constant 0 : i32
    %c0_i32_1 = arith.constant 0 : i32
    return %c0_i32, %arg0, %c0_i32_0 : i32, i32, i32
  }
}

</mosaic_0001>

<bundles_post_ra>
// kernel: lstm_model_forward.3
= control target key start
LH: loop header
LB: loop body
LE: loop exit
PB: predicated region body
PF: predicated region fallthrough
CT: control target
= control target key end

     0   :  { %v158_v1 = vmov 0.0   ;;  %vm159_vm0 = vmmov 0   ;;  %s207_s0 = inlined_call_operand.vmem [shape: bf16[16,32], index: 0, kind: input, shape index: {}]   ;;  %s208_s1 = inlined_call_operand.vmem [shape: bf16[32,50], index: 1, kind: input, shape index: {}]   ;;  %s209_s2 = inlined_call_operand.vmem [shape: f32[1,50], index: 2, kind: input, shape index: {}]   ;;  %s210_s3 = inlined_call_operand.hbm [shape: f32[16,50], index: 3, kind: output, shape index: {}]  }
   0x1   :  { %v131_v0 = vld [vmem:[%s208_s1] sm:$0xff]   ;;  %118 = vmatprep.subr.bf16.mxu0 %v158_v1  ;;  %v132_v2 = vld [vmem:[%s208_s1 + $0x8] sm:$0xff]   ;;  %122 = vmatprep.mubr.msk.bf16.mxu0 %vm159_vm0, %v158_v1 }
   0x2   :  { %119 = vmatpush3.bf16.msra.mxu0 %v131_v0 }
   0x3   :  { %120 = vmatprep.subr.bf16.mxu0 %v158_v1 }
   0x4   :  { %8 = vsyncpa [#allocation3], 0  ;;  %v133_v3 = vld [vmem:[%s207_s0] sm:$0xff]   ;;  %vm46_vm1 = vcmask 261120   ;;  %s160_s20 = smov [#allocation2]   ;;  %vm91_vm2 = vcmask 408576  }
   0x5   :  { %v110_v4 = vld [vmem:[%s209_s2] ss:$0 sm:$0xff]  ;;  %s99_s21 = sshll.u32 %s160_s20, 4  ;;  %s100_s21 = int_to_ptr.vmem [resolvable:$true] %s99_s21 }
   0x6   :  { %121 = vmatpush3.bf16.msra.mxu0 %v132_v2  ;;  %s134_s0 = scalar_lea.vmem %s100_s21, 256  ;;  %p139_p1 = scmp.lt.s32.totalorder %s100_s21, %s100_s21 }
   0x7   :  { %p135_p0 = scmp.ne.s32.totalorder %s100_s21, %s134_s0  ;;  %p140_p2 = scmp.lt.s32.totalorder %s134_s0, %s134_s0 }
   0x9   :  { %123 = vmatmul.mubr.msk.bf16.vlgmr.msra.gmra.mrb[0].mxu0 %vm46_vm1, %v133_v3  ;;  %p141_p3 = por %p140_p2, %p139_p1 }
   0xb   :  { %p142_p4 = pnand %p141_p3, %p135_p0 }
  0xdc   :  { %v84_v5 = vpop.f32.mrb[0].mxu0 }
  0xdd   :  { %v85_v6 = vadd.f32 %v110_v4, %v84_v5  ;;  %v124_v7 = vpop.f32.mrb[1].mxu0 }
  0xde   :  { %v87_v8 = vpop.f32.mrb[2].mxu0 }
  0xdf   :  { %92 = vst.msk [vmem:[#allocation2] sm:$0xff] %vm91_vm2, %v85_v6  ;;  %v88_v9 = vadd.f32 %v110_v4, %v87_v8  ;;  %v125_v10 = vpop.f32.mrb[3].mxu0 }
  0xe1   :  { %93 = vst.msk [vmem:[#allocation2 + $0x8] sm:$0xff] %vm91_vm2, %v88_v9 }
  0xe2   :  { %145 = shalt.err (!%p142_p4)
}
  0xe3   :  { %s146_s22 = scalar_lea.hbm %s210_s3, 256 }
  0xe4   :  { %p147_p5 = scmp.ne.s32.totalorder %s210_s3, %s146_s22  ;;  %p150_p6 = scmp.lt.u32.totalorder %s146_s22, %s210_s3 }
  0xe6   :  { %p152_p7 = pnand %p150_p6, %p147_p5 }
  0xe8   :  { %155 = shalt.err (!%p152_p7)
}
  0xe9   :  { %s161_s27 = smov 128   ;;  %s162_s28 = smov 8  }
  0xea   :  { %105 = dma.vmem_to_hbm [thread:$0]  %s100_s21, 256, %s210_s3, [#allocation3], %s161_s27, %s161_s27, %s162_s28  }
  0xeb   :  { %156 = dma.done.wait [#allocation3], 256  }
  0xec   :  { %157 = vsyncadd [#allocation3], 4294967040 }
  0xed   :  { %109 = vsyncpa [#allocation3], 1 }

// kernel: lstm_model_forward.2
= control target key start
LH: loop header
LB: loop body
LE: loop exit
PB: predicated region body
PF: predicated region fallthrough
CT: control target
= control target key end

     0   :  { %v1186_v0 = vmov 0.0   ;;  %vm1187_vm0 = vmmov 0   ;;  %vm26_vm1 = vcmask 254976   ;;  %vm51_vm2 = vcmask 261120   ;;  %s1188_s30 = smov 64   ;;  %s1189_s7 = smov 32   ;;  %s1455_s3 = inlined_call_operand.vmem [shape: bf16[32,128], index: 3, kind: input, shape index: {}]   ;;  %s1456_s1 = inlined_call_operand.vmem [shape: f32[1,2,32], index: 1, kind: input, shape index: {}, may-alias: {1,5}]   ;;  %s1457_s2 = inlined_call_operand.vmem [shape: f32[1,2,32], index: 2, kind: input, shape index: {}, may-alias: {2,6}]   ;;  %s1458_s0 = inlined_call_operand.vmem [shape: bf16[8,2,128], index: 0, kind: input, shape index: {}]   ;;  %s1459_s4 = inlined_call_operand.vmem [shape: bf16[8,2,32], index: 4, kind: output, shape index: {0}]   ;;  %s1460_s5 = inlined_call_operand.vmem [shape: f32[1,2,32], index: 5, kind: output, shape index: {1}, may-alias: {1,5}]   ;;  %s1461_s6 = inlined_call_operand.vmem [shape: f32[1,2,32], index: 6, kind: output, shape index: {2}, may-alias: {2,6}]  }
   0x1   :  { %1035 = vmatprep.subr.bf16.mxu0 %v1186_v0  ;;  %v1106_v1 = vld [vmem:[%s1455_s3] sm:$0xff]   ;;  %1039 = vmatprep.mubr.msk.bf16.mxu0 %vm1187_vm0, %v1186_v0  ;;  %v1107_v2 = vld [vmem:[%s1455_s3 + $0x8] sm:$0xff]   ;;  %vm150_vm3 = vcmask 253952   ;;  %s1192_s12 = smov 96  }
   0x2   :  { %1043 = vmatprep.subr.bf16.mxu1 %v1186_v0  ;;  %1047 = vmatprep.mubr.msk.bf16.mxu1 %vm1187_vm0, %v1186_v0  ;;  %v25_v3 = vld [vmem:[%s1456_s1] sm:$0x3]  ;;  %v1109_v27 = vld [vmem:[%s1455_s3 + $0x8] sm:$0xff]   ;;  %v975_v57 = vld [vmem:[%s1458_s0 + $0x2] sm:$0x1] }
   0x3   :  { %1036 = vmatpush3.bf16.msra.mxu0 %v1106_v1  ;;  %27 = vst.msk [vmem:[#allocation2] sm:$0x3] %vm26_vm1, %v25_v3  ;;  %v28_v6 = vld [vmem:[%s1457_s2] sm:$0x3]  ;;  %v1111_v51 = vld [vmem:[%s1455_s3 + $0x8] sm:$0xff]   ;;  %v264_v58 = vunpack.c.l.bf16 %v975_v57 }
   0x4   :  { %1037 = vmatprep.subr.bf16.mxu0 %v1186_v0  ;;  %29 = vst.msk [vmem:[#allocation3] sm:$0x3] %vm26_vm1, %v28_v6  ;;  %v32_v7 = vld [vmem:[%s1458_s0] sm:$0x1]  ;;  %v969_v33 = vld [vmem:[%s1458_s0 + $0x1] sm:$0x1] }
   0x5   :  { %v33_v8 = vunpack.c.l.bf16 %v32_v7  ;;  %v1108_v26 = vld [vmem:[%s1455_s3] sm:$0xff]   ;;  %v154_v34 = vunpack.c.l.bf16 %v969_v33 }
   0x6   :  { %1044 = vmatpush3.bf16.msra.mxu1 %v1108_v26  ;;  %v1110_v50 = vld [vmem:[%s1455_s3] sm:$0xff]  }
   0x7   :  { %1038 = vmatpush3.bf16.msra.mxu0 %v1107_v2  ;;  %1045 = vmatprep.subr.bf16.mxu1 %v1186_v0 }
   0x8   :  { %1051 = vmatprep.subr.bf16.mxu0 %v1186_v0 }
   0xa   :  { %v30_v4 = vld [vmem:[#allocation2] sm:$0x3]  ;;  %1046 = vmatpush3.bf16.msra.mxu1 %v1109_v27 }
   0xb   :  { %v34_v5 = vpack.c.bf16 %v30_v4, %v30_v4  ;;  %v968_v15 = vld.sshfl [vmem:[#allocation3] sm:$0x3 pattern:$0x76325410]  ;;  %1059 = vmatprep.subr.bf16.mxu1 %v1186_v0 }
   0xd   :  { %1040 = vmatmul.mubr.msk.bf16.vlgmr.msra.gmra.mrb[0].mxu0 %vm51_vm2, %v34_v5 }
   0xe   :  { %1055 = vmatprep.mubr.msk.bf16.mxu0 %vm1187_vm0, %v1186_v0  ;;  %1052 = vmatpush3.bf16.msra.mxu0 %v1110_v50 }
   0xf   :  { %1053 = vmatprep.subr.bf16.mxu0 %v1186_v0 }
  0x12   :  { %1054 = vmatpush3.bf16.msra.mxu0 %v1111_v51 }
  0x13   :  { %1067 = vmatprep.subr.bf16.mxu0 %v1186_v0 }
  0xe0   :  { %v89_v9 = vpop.f32.mrb[0].mxu0 }
  0xe1   :  { %v95_v10 = vadd.f32 %v89_v9, %v33_v8  ;;  %v1041_v11 = vpop.f32.mrb[1].mxu0 }
  0xe2   :  { %v92_v12 = vpop.f32.mrb[2].mxu0  ;;  %v1112_v11 = vld [vmem:[%s1455_s3] sm:$0xff]  }
  0xe3   :  { %1122 = vtanh.f32 %v95_v10  ;;  %v1042_v13 = vpop.f32.mrb[3].mxu0  ;;  %v967_v16 = vmul.f32 -1.442695, %v95_v10  ;;  %v1113_v12 = vld [vmem:[%s1455_s3 + $0x8] sm:$0xff]  }
  0xe5   :  { %1124 = vpow2.f32 %v967_v16 }
  0xed   :  { %v1123_v14 = vpop.eup %1122 }
  0xee   :  { %116 = vrot.lane.b32.xlu0 %v1123_v14, %s1188_s30 }
  0xef   :  { %v1125_v17 = vpop.eup %1124 }
  0xf0   :  { %v99_v18 = vadd.f32 1.0, %v1125_v17 }
  0xf2   :  { %111 = vrot.lane.b32.xlu0 %v968_v15, %s1189_s7  ;;  %1126 = vrcp.f32 %v99_v18  ;;  %v981_v18 = vld [vmem:[%s1458_s0 + $0x3] sm:$0x1] }
  0xfc   :  { %v1127_v19 = vpop.eup %1126 }
 0x160   :  { %v117_v20 = vpop.permute.xlu0 %116 }
 0x161   :  { %v119_v21 = vmul.f32 %v1127_v19, %v117_v20 }
 0x163   :  { %121 = vrot.lane.b32.xlu1 %v119_v21, %s1189_s7 }
 0x164   :  { %v112_v22 = vpop.permute.xlu0 %111 }
 0x165   :  { %v114_v23 = vmul.f32 %v1127_v19, %v112_v22 }
 0x1d5   :  { %v122_v24 = vpop.permute.xlu1 %121 }
 0x1d6   :  { %v124_v25 = vadd.f32 %v122_v24, %v114_v23 }
 0x1d8   :  { %1128 = vtanh.f32 %v124_v25 }
 0x1e2   :  { %v1129_v28 = vpop.eup %1128 }
 0x1e3   :  { %127 = vrot.lane.b32.xlu1 %v1129_v28, %s1188_s30 }
 0x255   :  { %v128_v29 = vpop.permute.xlu1 %127 }
 0x256   :  { %v130_v30 = vmul.f32 %v1127_v19, %v128_v29  ;;  %v374_v19 = vunpack.c.l.bf16 %v981_v18 }
 0x258   :  { %v1268_v31 = vpack.c.bf16 %v130_v30, %v130_v30 }
 0x25a   :  { %159 = vrot.lane.b32.xlu0 %v1268_v31, %s1189_s7 }
 0x2cc   :  { %v160_v32 = vpop.permute.xlu0 %159 }
 0x2cd   :  { %1048 = vmatmul.mubr.msk.bf16.vlgmr.msra.gmra.mrb[0].mxu1 %vm51_vm2, %v160_v32 }
 0x2ce   :  { %1063 = vmatprep.mubr.msk.bf16.mxu1 %vm1187_vm0, %v1186_v0  ;;  %1060 = vmatpush3.bf16.msra.mxu1 %v1112_v11 }
 0x2cf   :  { %1061 = vmatprep.subr.bf16.mxu1 %v1186_v0 }
 0x2d2   :  { %1062 = vmatpush3.bf16.msra.mxu1 %v1113_v12 }
 0x2d3   :  { %1075 = vmatprep.subr.bf16.mxu1 %v1186_v0 }
 0x3a0   :  { %v210_v35 = vpop.f32.mrb[0].mxu1 }
 0x3a1   :  { %v216_v36 = vadd.f32 %v210_v35, %v154_v34  ;;  %v1049_v37 = vpop.f32.mrb[1].mxu1 }
 0x3a2   :  { %v213_v38 = vpop.f32.mrb[2].mxu1  ;;  %v1115_v37 = vld [vmem:[%s1455_s3 + $0x8] sm:$0xff]  }
 0x3a3   :  { %1130 = vtanh.f32 %v216_v36  ;;  %v1050_v39 = vpop.f32.mrb[3].mxu1  ;;  %v973_v41 = vmul.f32 -1.442695, %v216_v36  ;;  %v1114_v36 = vld [vmem:[%s1455_s3] sm:$0xff]  }
 0x3a5   :  { %1132 = vpow2.f32 %v973_v41 }
 0x3ad   :  { %v1131_v40 = vpop.eup %1130 }
 0x3ae   :  { %226 = vrot.lane.b32.xlu1 %v1131_v40, %s1188_s30 }
 0x3af   :  { %v1133_v42 = vpop.eup %1132 }
 0x3b0   :  { %v220_v43 = vadd.f32 1.0, %v1133_v42 }
 0x3b2   :  { %1134 = vrcp.f32 %v220_v43  ;;  %v987_v43 = vld [vmem:[%s1458_s0 + $0x4] sm:$0x1] }
 0x3bc   :  { %v1135_v44 = vpop.eup %1134 }
 0x3bd   :  { %v224_v47 = vmul.f32 %v1135_v44, %v124_v25 }
 0x420   :  { %v227_v45 = vpop.permute.xlu1 %226 }
 0x421   :  { %v229_v46 = vmul.f32 %v1135_v44, %v227_v45 }
 0x423   :  { %231 = vrot.lane.b32.xlu0 %v229_v46, %s1189_s7 }
 0x495   :  { %v232_v48 = vpop.permute.xlu0 %231 }
 0x496   :  { %v234_v49 = vadd.f32 %v232_v48, %v224_v47 }
 0x498   :  { %1136 = vtanh.f32 %v234_v49 }
 0x4a2   :  { %v1137_v52 = vpop.eup %1136 }
 0x4a3   :  { %237 = vrot.lane.b32.xlu1 %v1137_v52, %s1188_s30 }
 0x515   :  { %v238_v53 = vpop.permute.xlu1 %237 }
 0x516   :  { %v240_v54 = vmul.f32 %v1135_v44, %v238_v53  ;;  %v484_v44 = vunpack.c.l.bf16 %v987_v43 }
 0x518   :  { %v1289_v55 = vpack.c.bf16 %v240_v54, %v240_v54 }
 0x51a   :  { %269 = vrot.lane.b32.xlu0 %v1289_v55, %s1189_s7 }
 0x58c   :  { %v270_v56 = vpop.permute.xlu0 %269 }
 0x58d   :  { %1056 = vmatmul.mubr.msk.bf16.vlgmr.msra.gmra.mrb[4].mxu0 %vm51_vm2, %v270_v56 }
 0x58e   :  { %1071 = vmatprep.mubr.msk.bf16.mxu0 %vm1187_vm0, %v1186_v0  ;;  %1068 = vmatpush3.bf16.msra.mxu0 %v1114_v36 }
 0x58f   :  { %1069 = vmatprep.subr.bf16.mxu0 %v1186_v0 }
 0x592   :  { %1070 = vmatpush3.bf16.msra.mxu0 %v1115_v37 }
 0x593   :  { %1083 = vmatprep.subr.bf16.mxu0 %v1186_v0 }
 0x660   :  { %v320_v59 = vpop.f32.mrb[4].mxu0 }
 0x661   :  { %v326_v60 = vadd.f32 %v320_v59, %v264_v58  ;;  %v1057_v61 = vpop.f32.mrb[5].mxu0 }
 0x662   :  { %v323_v62 = vpop.f32.mrb[6].mxu0  ;;  %v1116_v61 = vld [vmem:[%s1455_s3] sm:$0xff]  }
 0x663   :  { %1138 = vtanh.f32 %v326_v60  ;;  %v1058_v63 = vpop.f32.mrb[7].mxu0  ;;  %v979_v2 = vmul.f32 -1.442695, %v326_v60  ;;  %v1117_v62 = vld [vmem:[%s1455_s3 + $0x8] sm:$0xff]  }
 0x665   :  { %1140 = vpow2.f32 %v979_v2 }
 0x66d   :  { %v1139_v1 = vpop.eup %1138 }
 0x66e   :  { %336 = vrot.lane.b32.xlu1 %v1139_v1, %s1188_s30 }
 0x66f   :  { %v1141_v3 = vpop.eup %1140 }
 0x670   :  { %v330_v4 = vadd.f32 1.0, %v1141_v3 }
 0x672   :  { %1142 = vrcp.f32 %v330_v4 }
 0x67c   :  { %v1143_v5 = vpop.eup %1142 }
 0x67d   :  { %v334_v8 = vmul.f32 %v1143_v5, %v234_v49 }
 0x6e0   :  { %v337_v6 = vpop.permute.xlu1 %336 }
 0x6e1   :  { %v339_v7 = vmul.f32 %v1143_v5, %v337_v6 }
 0x6e3   :  { %341 = vrot.lane.b32.xlu0 %v339_v7, %s1189_s7 }
 0x755   :  { %v342_v9 = vpop.permute.xlu0 %341 }
 0x756   :  { %v344_v10 = vadd.f32 %v342_v9, %v334_v8 }
 0x758   :  { %1144 = vtanh.f32 %v344_v10 }
 0x762   :  { %v1145_v13 = vpop.eup %1144 }
 0x763   :  { %347 = vrot.lane.b32.xlu1 %v1145_v13, %s1188_s30 }
 0x7d5   :  { %v348_v14 = vpop.permute.xlu1 %347 }
 0x7d6   :  { %v350_v15 = vmul.f32 %v1143_v5, %v348_v14  ;;  %v993_v5 = vld [vmem:[%s1458_s0 + $0x5] sm:$0x1] }
 0x7d7   :  { %v594_v6 = vunpack.c.l.bf16 %v993_v5  ;;  %v1190_v5 = vmov 1966171168  }
 0x7d8   :  { %v1310_v16 = vpack.c.bf16 %v350_v15, %v350_v15 }
 0x7da   :  { %379 = vrot.lane.b32.xlu0 %v1310_v16, %s1189_s7 }
 0x84c   :  { %v380_v17 = vpop.permute.xlu0 %379 }
 0x84d   :  { %1064 = vmatmul.mubr.msk.bf16.vlgmr.msra.gmra.mrb[4].mxu1 %vm51_vm2, %v380_v17 }
 0x84e   :  { %1079 = vmatprep.mubr.msk.bf16.mxu1 %vm1187_vm0, %v1186_v0  ;;  %1076 = vmatpush3.bf16.msra.mxu1 %v1116_v61 }
 0x84f   :  { %1077 = vmatprep.subr.bf16.mxu1 %v1186_v0 }
 0x852   :  { %1078 = vmatpush3.bf16.msra.mxu1 %v1117_v62 }
 0x853   :  { %1091 = vmatprep.subr.bf16.mxu1 %v1186_v0 }
 0x920   :  { %v430_v20 = vpop.f32.mrb[4].mxu1 }
 0x921   :  { %v436_v21 = vadd.f32 %v430_v20, %v374_v19  ;;  %v1065_v22 = vpop.f32.mrb[5].mxu1 }
 0x922   :  { %v433_v23 = vpop.f32.mrb[6].mxu1 }
 0x923   :  { %1146 = vtanh.f32 %v436_v21  ;;  %v1066_v24 = vpop.f32.mrb[7].mxu1  ;;  %v985_v26 = vmul.f32 -1.442695, %v436_v21  ;;  %v1118_v23 = vld [vmem:[%s1455_s3] sm:$0xff]  }
 0x924   :  { %v1119_v24 = vld [vmem:[%s1455_s3 + $0x8] sm:$0xff]  }
 0x925   :  { %1148 = vpow2.f32 %v985_v26 }
 0x92d   :  { %v1147_v25 = vpop.eup %1146 }
 0x92e   :  { %446 = vrot.lane.b32.xlu1 %v1147_v25, %s1188_s30 }
 0x92f   :  { %v1149_v27 = vpop.eup %1148 }
 0x930   :  { %v440_v28 = vadd.f32 1.0, %v1149_v27 }
 0x932   :  { %1150 = vrcp.f32 %v440_v28 }
 0x93c   :  { %v1151_v29 = vpop.eup %1150 }
 0x93d   :  { %v444_v33 = vmul.f32 %v1151_v29, %v344_v10 }
 0x9a0   :  { %v447_v30 = vpop.permute.xlu1 %446 }
 0x9a1   :  { %v449_v32 = vmul.f32 %v1151_v29, %v447_v30  ;;  %v999_v30 = vld [vmem:[%s1458_s0 + $0x6] sm:$0x1] }
 0x9a3   :  { %451 = vrot.lane.b32.xlu0 %v449_v32, %s1189_s7  ;;  %v704_v32 = vunpack.c.l.bf16 %v999_v30 }
 0xa15   :  { %v452_v34 = vpop.permute.xlu0 %451 }
 0xa16   :  { %v454_v35 = vadd.f32 %v452_v34, %v444_v33 }
 0xa18   :  { %1152 = vtanh.f32 %v454_v35 }
 0xa22   :  { %v1153_v38 = vpop.eup %1152 }
 0xa23   :  { %457 = vrot.lane.b32.xlu1 %v1153_v38, %s1188_s30 }
 0xa95   :  { %v458_v39 = vpop.permute.xlu1 %457 }
 0xa96   :  { %v460_v40 = vmul.f32 %v1151_v29, %v458_v39 }
 0xa98   :  { %v1331_v41 = vpack.c.bf16 %v460_v40, %v460_v40 }
 0xa9a   :  { %489 = vrot.lane.b32.xlu0 %v1331_v41, %s1189_s7 }
 0xb0c   :  { %v490_v42 = vpop.permute.xlu0 %489 }
 0xb0d   :  { %1072 = vmatmul.mubr.msk.bf16.vlgmr.msra.gmra.mrb[8].mxu0 %vm51_vm2, %v490_v42 }
 0xb0e   :  { %1087 = vmatprep.mubr.msk.bf16.mxu0 %vm1187_vm0, %v1186_v0  ;;  %1084 = vmatpush3.bf16.msra.mxu0 %v1118_v23 }
 0xb0f   :  { %1085 = vmatprep.subr.bf16.mxu0 %v1186_v0 }
 0xb12   :  { %1086 = vmatpush3.bf16.msra.mxu0 %v1119_v24 }
 0xbe0   :  { %v540_v45 = vpop.f32.mrb[8].mxu0 }
 0xbe1   :  { %v546_v46 = vadd.f32 %v540_v45, %v484_v44  ;;  %v1073_v47 = vpop.f32.mrb[9].mxu0 }
 0xbe2   :  { %v543_v48 = vpop.f32.mrb[10].mxu0 }
 0xbe3   :  { %1154 = vtanh.f32 %v546_v46  ;;  %v1074_v49 = vpop.f32.mrb[11].mxu0  ;;  %v991_v51 = vmul.f32 -1.442695, %v546_v46 }
 0xbe4   :  { %v1120_v49 = vld [vmem:[%s1455_s3] sm:$0xff]  }
 0xbe5   :  { %1156 = vpow2.f32 %v991_v51 }
 0xbed   :  { %v1155_v50 = vpop.eup %1154 }
 0xbee   :  { %556 = vrot.lane.b32.xlu1 %v1155_v50, %s1188_s30  ;;  %v1121_v50 = vld [vmem:[%s1455_s3 + $0x8] sm:$0xff]  }
 0xbef   :  { %v1157_v52 = vpop.eup %1156 }
 0xbf0   :  { %v550_v53 = vadd.f32 1.0, %v1157_v52 }
 0xbf2   :  { %1158 = vrcp.f32 %v550_v53 }
 0xbfc   :  { %v1159_v54 = vpop.eup %1158 }
 0xbfd   :  { %v554_v58 = vmul.f32 %v1159_v54, %v454_v35 }
 0xc60   :  { %v557_v56 = vpop.permute.xlu1 %556 }
 0xc61   :  { %v559_v57 = vmul.f32 %v1159_v54, %v557_v56 }
 0xc63   :  { %561 = vrot.lane.b32.xlu0 %v559_v57, %s1189_s7  ;;  %v1005_v57 = vld [vmem:[%s1458_s0 + $0x7] sm:$0x1] }
 0xcd5   :  { %v562_v59 = vpop.permute.xlu0 %561 }
 0xcd6   :  { %v564_v60 = vadd.f32 %v562_v59, %v554_v58  ;;  %v814_v58 = vunpack.c.l.bf16 %v1005_v57 }
 0xcd8   :  { %1160 = vtanh.f32 %v564_v60 }
 0xce2   :  { %v1161_v63 = vpop.eup %1160 }
 0xce3   :  { %567 = vrot.lane.b32.xlu1 %v1161_v63, %s1188_s30 }
 0xd55   :  { %v568_v1 = vpop.permute.xlu1 %567 }
 0xd56   :  { %v570_v2 = vmul.f32 %v1159_v54, %v568_v1 }
 0xd58   :  { %v1352_v3 = vpack.c.bf16 %v570_v2, %v570_v2 }
 0xd5a   :  { %599 = vrot.lane.b32.xlu0 %v1352_v3, %s1189_s7 }
 0xdcc   :  { %v600_v4 = vpop.permute.xlu0 %599 }
 0xdcd   :  { %1080 = vmatmul.mubr.msk.bf16.vlgmr.msra.gmra.mrb[8].mxu1 %vm51_vm2, %v600_v4 }
 0xdce   :  { %1095 = vmatprep.mubr.msk.bf16.mxu1 %vm1187_vm0, %v1186_v0  ;;  %1092 = vmatpush3.bf16.msra.mxu1 %v1120_v49 }
 0xdcf   :  { %1093 = vmatprep.subr.bf16.mxu1 %v1186_v0 }
 0xdd2   :  { %1094 = vmatpush3.bf16.msra.mxu1 %v1121_v50 }
 0xea0   :  { %v650_v7 = vpop.f32.mrb[8].mxu1 }
 0xea1   :  { %v656_v8 = vadd.f32 %v650_v7, %v594_v6  ;;  %v1081_v9 = vpop.f32.mrb[9].mxu1  ;;  %v134_v6 = vunpack.c.l.s4 %v1190_v5  ;;  %v136_v7 = vlaneseq }
 0xea2   :  { %v653_v10 = vpop.f32.mrb[10].mxu1 }
 0xea3   :  { %1162 = vtanh.f32 %v656_v8  ;;  %v1082_v11 = vpop.f32.mrb[11].mxu1  ;;  %v997_v13 = vmul.f32 -1.442695, %v656_v8  ;;  %v135_v8 = vunpack.c.0.s8 %v134_v6  ;;  %v137_v9 = vshrl.u32 %v136_v7, 7 }
 0xea5   :  { %1164 = vpow2.f32 %v997_v13  ;;  %v138_v10 = vsub.s32 %v135_v8, %v137_v9 }
 0xea7   :  { %v139_v13 = vrot.slane %v1268_v31, %v138_v10 }
 0xead   :  { %v1163_v12 = vpop.eup %1162 }
 0xeae   :  { %666 = vrot.lane.b32.xlu1 %v1163_v12, %s1188_s30 }
 0xeaf   :  { %v1165_v14 = vpop.eup %1164 }
 0xeb0   :  { %v660_v15 = vadd.f32 1.0, %v1165_v14 }
 0xeb2   :  { %1166 = vrcp.f32 %v660_v15  ;;  %v359_v15 = vrot.slane %v1310_v16, %v138_v10 }
 0xebc   :  { %v1167_v17 = vpop.eup %1166 }
 0xebd   :  { %v664_v20 = vmul.f32 %v1167_v17, %v564_v60 }
 0xf20   :  { %v667_v18 = vpop.permute.xlu1 %666 }
 0xf21   :  { %v669_v19 = vmul.f32 %v1167_v17, %v667_v18  ;;  %v579_v18 = vrot.slane %v1352_v3, %v138_v10 }
 0xf23   :  { %671 = vrot.lane.b32.xlu0 %v669_v19, %s1189_s7  ;;  %v366_v19 = vrot.slane %v359_v15, %v138_v10 }
 0xf95   :  { %v672_v21 = vpop.permute.xlu0 %671 }
 0xf96   :  { %v674_v22 = vadd.f32 %v672_v21, %v664_v20  ;;  %v586_v21 = vrot.slane %v579_v18, %v138_v10 }
 0xf98   :  { %1168 = vtanh.f32 %v674_v22 }
 0xfa2   :  { %v1169_v25 = vpop.eup %1168 }
 0xfa3   :  { %677 = vrot.lane.b32.xlu1 %v1169_v25, %s1188_s30  ;;  %v249_v25 = vrot.slane %v1289_v55, %v138_v10 }
0x1015   :  { %v678_v26 = vpop.permute.xlu1 %677 }
0x1016   :  { %v680_v27 = vmul.f32 %v1167_v17, %v678_v26  ;;  %v146_v17 = vrot.slane %v139_v13, %v138_v10 }
0x1018   :  { %v1372_v28 = vpack.c.bf16 %v680_v27, %v680_v27 }
0x101a   :  { %709 = vrot.lane.b32.xlu0 %v1372_v28, %s1189_s7  ;;  %v689_v55 = vrot.slane %v1372_v28, %v138_v10 }
0x108c   :  { %v710_v29 = vpop.permute.xlu0 %709 }
0x108d   :  { %1088 = vmatmul.mubr.msk.bf16.vlgmr.msra.gmra.mrb[12].mxu0 %vm51_vm2, %v710_v29  ;;  %v469_v29 = vrot.slane %v1331_v41, %v138_v10 }
0x1160   :  { %v760_v33 = vpop.f32.mrb[12].mxu0 }
0x1161   :  { %v766_v34 = vadd.f32 %v760_v33, %v704_v32  ;;  %v1089_v35 = vpop.f32.mrb[13].mxu0  ;;  %v256_v32 = vrot.slane %v249_v25, %v138_v10  ;;  %v476_v33 = vrot.slane %v469_v29, %v138_v10 }
0x1162   :  { %v763_v36 = vpop.f32.mrb[14].mxu0  ;;  %v1191_v35 = vmov 1983009808  }
0x1163   :  { %1170 = vtanh.f32 %v766_v34  ;;  %v1090_v37 = vpop.f32.mrb[15].mxu0  ;;  %v1003_v39 = vmul.f32 -1.442695, %v766_v34  ;;  %v696_v34 = vrot.slane %v689_v55, %v138_v10  ;;  %v924_v36 = vunpack.c.l.s4 %v1191_v35 }
0x1165   :  { %1172 = vpow2.f32 %v1003_v39  ;;  %v925_v41 = vunpack.c.0.s8 %v924_v36 }
0x116d   :  { %v1171_v38 = vpop.eup %1170 }
0x116e   :  { %776 = vrot.lane.b32.xlu1 %v1171_v38, %s1188_s30  ;;  %v928_v38 = vsub.s32 %v925_v41, %v137_v9 }
0x116f   :  { %v1173_v40 = vpop.eup %1172 }
0x1170   :  { %v770_v42 = vadd.f32 1.0, %v1173_v40 }
0x1172   :  { %1174 = vrcp.f32 %v770_v42 }
0x117c   :  { %v1175_v43 = vpop.eup %1174 }
0x117d   :  { %v774_v46 = vmul.f32 %v1175_v43, %v674_v22 }
0x11e0   :  { %v777_v44 = vpop.permute.xlu1 %776 }
0x11e1   :  { %v779_v45 = vmul.f32 %v1175_v43, %v777_v44 }
0x11e3   :  { %781 = vrot.lane.b32.xlu0 %v779_v45, %s1189_s7 }
0x1255   :  { %v782_v47 = vpop.permute.xlu0 %781 }
0x1256   :  { %v784_v48 = vadd.f32 %v782_v47, %v774_v46 }
0x1258   :  { %1176 = vtanh.f32 %v784_v48 }
0x1262   :  { %v1177_v51 = vpop.eup %1176 }
0x1263   :  { %787 = vrot.lane.b32.xlu1 %v1177_v51, %s1188_s30 }
0x12d5   :  { %v788_v52 = vpop.permute.xlu1 %787 }
0x12d6   :  { %v790_v53 = vmul.f32 %v1175_v43, %v788_v52 }
0x12d8   :  { %v791_v54 = vpack.c.bf16 %v790_v53, %v790_v53 }
0x12da   :  { %819 = vrot.lane.b32.xlu0 %v791_v54, %s1189_s7  ;;  %v799_v20 = vrot.slane %v791_v54, %v138_v10 }
0x12dc   :  { %v806_v22 = vrot.slane %v799_v20, %v138_v10 }
0x134c   :  { %v820_v56 = vpop.permute.xlu0 %819 }
0x134d   :  { %1096 = vmatmul.mubr.msk.bf16.vlgmr.msra.gmra.mrb[12].mxu1 %vm51_vm2, %v820_v56 }
0x1420   :  { %v870_v59 = vpop.f32.mrb[12].mxu1 }
0x1421   :  { %v876_v60 = vadd.f32 %v870_v59, %v814_v58  ;;  %v1097_v0 = vpop.f32.mrb[13].mxu1 }
0x1422   :  { %v873_v61 = vpop.f32.mrb[14].mxu1 }
0x1423   :  { %1178 = vtanh.f32 %v876_v60  ;;  %v1098_v62 = vpop.f32.mrb[15].mxu1  ;;  %v1009_v1 = vmul.f32 -1.442695, %v876_v60 }
0x1425   :  { %1180 = vpow2.f32 %v1009_v1 }
0x142d   :  { %v1179_v63 = vpop.eup %1178 }
0x142e   :  { %886 = vrot.lane.b32.xlu1 %v1179_v63, %s1188_s30 }
0x142f   :  { %v1181_v2 = vpop.eup %1180 }
0x1430   :  { %v880_v4 = vadd.f32 1.0, %v1181_v2 }
0x1432   :  { %1182 = vrcp.f32 %v880_v4 }
0x143c   :  { %v1183_v11 = vpop.eup %1182 }
0x143d   :  { %v884_v31 = vmul.f32 %v1183_v11, %v784_v48 }
0x14a0   :  { %v887_v12 = vpop.permute.xlu1 %886 }
0x14a1   :  { %v889_v14 = vmul.f32 %v1183_v11, %v887_v12 }
0x14a3   :  { %891 = vrot.lane.b32.xlu0 %v889_v14, %s1189_s7 }
0x14a7   :  { %147 = vrot.lane.b32.xlu0 %v146_v17, %s1189_s7 }
0x14ab   :  { %367 = vrot.lane.b32.xlu0 %v366_v19, %s1189_s7 }
0x14af   :  { %587 = vrot.lane.b32.xlu0 %v586_v21, %s1189_s7 }
0x14b3   :  { %807 = vrot.lane.b32.xlu0 %v806_v22, %s1189_s7 }
0x1515   :  { %v892_v23 = vpop.permute.xlu0 %891 }
0x1516   :  { %v894_v24 = vadd.f32 %v892_v23, %v884_v31 }
0x1518   :  { %1184 = vtanh.f32 %v894_v24  ;;  %v942_v46 = vrot.slane %v894_v24, %v928_v38 }
0x1519   :  { %v148_v16 = vpop.permute.xlu0 %147 }
0x151a   :  { %151 = vst.msk [vmem:[%s1459_s4] sm:$0x1] %vm150_vm3, %v148_v16 }
0x151d   :  { %v368_v3 = vpop.permute.xlu0 %367 }
0x151e   :  { %980 = vst.msk [vmem:[%s1459_s4 + $0x2] sm:$0x1] %vm150_vm3, %v368_v3 }
0x1521   :  { %v588_v26 = vpop.permute.xlu0 %587 }
0x1522   :  { %v1185_v27 = vpop.eup %1184  ;;  %992 = vst.msk [vmem:[%s1459_s4 + $0x4] sm:$0x1] %vm150_vm3, %v588_v26 }
0x1523   :  { %897 = vrot.lane.b32.xlu1 %v1185_v27, %s1188_s30 }
0x1525   :  { %v808_v30 = vpop.permute.xlu0 %807 }
0x1526   :  { %1004 = vst.msk [vmem:[%s1459_s4 + $0x6] sm:$0x1] %vm150_vm3, %v808_v30 }
0x1527   :  { %257 = vrot.lane.b32.xlu1 %v256_v32, %s1189_s7 }
0x152b   :  { %477 = vrot.lane.b32.xlu1 %v476_v33, %s1189_s7 }
0x152f   :  { %697 = vrot.lane.b32.xlu1 %v696_v34, %s1189_s7 }
0x1595   :  { %v898_v37 = vpop.permute.xlu1 %897 }
0x1596   :  { %v900_v39 = vmul.f32 %v1183_v11, %v898_v37 }
0x1598   :  { %v901_v40 = vpack.c.bf16 %v900_v39, %v900_v39  ;;  %v929_v42 = vrot.slane %v900_v39, %v928_v38 }
0x1599   :  { %v258_v43 = vpop.permute.xlu1 %257 }
0x159a   :  { %v909_v44 = vrot.slane %v901_v40, %v138_v10  ;;  %974 = vst.msk [vmem:[%s1459_s4 + $0x1] sm:$0x1] %vm150_vm3, %v258_v43  ;;  %930 = vrot.lane.b32.xlu0 %v929_v42, %s1189_s7 }
0x159c   :  { %v916_v28 = vrot.slane %v909_v44, %v138_v10 }
0x159d   :  { %v478_v45 = vpop.permute.xlu1 %477 }
0x159e   :  { %986 = vst.msk [vmem:[%s1459_s4 + $0x3] sm:$0x1] %vm150_vm3, %v478_v45  ;;  %917 = vrot.lane.b32.xlu1 %v916_v28, %s1189_s7 }
0x15a1   :  { %v698_v47 = vpop.permute.xlu1 %697 }
0x15a2   :  { %998 = vst.msk [vmem:[%s1459_s4 + $0x5] sm:$0x1] %vm150_vm3, %v698_v47  ;;  %943 = vrot.lane.b32.xlu1 %v942_v46, %s1192_s12 }
0x160c   :  { %v931_v48 = vpop.permute.xlu0 %930 }
0x160d   :  { %934 = vst.msk [vmem:[#allocation2] sm:$0x3] %vm26_vm1, %v931_v48  ;;  %950 = vst.msk [vmem:[%s1460_s5] sm:$0x3] %vm26_vm1, %v931_v48 }
0x1610   :  { %v918_v49 = vpop.permute.xlu1 %917 }
0x1611   :  { %1010 = vst.msk [vmem:[%s1459_s4 + $0x7] sm:$0x1] %vm150_vm3, %v918_v49 }
0x1614   :  { %v944_v50 = vpop.permute.xlu1 %943 }
0x1615   :  { %946 = vst.msk [vmem:[#allocation3] sm:$0x3] %vm26_vm1, %v944_v50  ;;  %951 = vst.msk [vmem:[%s1461_s6] sm:$0x3] %vm26_vm1, %v944_v50 }

</bundles_post_ra>
